<compile_context>
chip_gen: v6e
topology: v6e:2x2x1
jax: 0.10.0
libtpu: 0.0.40
codegen_flags: <defaults>
</compile_context>

<pallas_src>
import math
from functools import partial

import jax
import jax.numpy as jnp
from jax.experimental import pallas as pl
from jax.experimental.pallas import tpu as pltpu


def _encoder_layer_kernel(n_heads, d_k, eps, compute_dtype,
                          x_ref,
                          wq_ref, bq_ref, wk_ref, bk_ref, wv_ref, bv_ref,
                          wo_ref, bo_ref,
                          w1_ref, b1_ref, w2_ref, b2_ref,
                          g1_ref, be1_ref, g2_ref, be2_ref,
                          o_ref):
    f32 = jnp.float32
    cd = compute_dtype

    # ---- hoisted loads (once per grid step) ----
    wq = wq_ref[...].astype(cd)     # (H, D, dk)
    wk = wk_ref[...].astype(cd)     # (H, D, dk)
    wv = wv_ref[...].astype(cd)     # (H, D, dk)
    wo = wo_ref[...].astype(cd)     # (H, dk, D)
    w1 = w1_ref[...].astype(cd)     # (D, Dff)
    w2 = w2_ref[...].astype(cd)     # (Dff, D)

    bq = bq_ref[...].astype(f32)    # (H, 1, dk)
    bk = bk_ref[...].astype(f32)
    bv = bv_ref[...].astype(f32)
    bo = bo_ref[...].astype(f32)    # (1, D)
    b1 = b1_ref[...].astype(f32)    # (1, Dff)
    b2 = b2_ref[...].astype(f32)    # (1, D)
    g1 = g1_ref[...].astype(f32)
    be1 = be1_ref[...].astype(f32)
    g2 = g2_ref[...].astype(f32)
    be2 = be2_ref[...].astype(f32)

    scale = 1.0 / math.sqrt(d_k)

    def layernorm(y, g, b):
        mu = jnp.mean(y, axis=-1, keepdims=True)
        var = jnp.mean((y - mu) ** 2, axis=-1, keepdims=True)
        return (y - mu) * jax.lax.rsqrt(var + eps) * g + b

    batch_block = x_ref.shape[0]
    for bb in range(batch_block):            # small static block of batch elems
        x = x_ref[bb].astype(f32)            # (S, D), f32 residual path
        x_c = x.astype(cd)
        x_h = jnp.broadcast_to(x_c, (n_heads,) + x_c.shape)    # (H, S, D)

        # ---- head-batched QKV projections (bf16 MXU, f32 accumulate) ----
        q = jnp.einsum('hsd,hde->hse', x_h, wq, preferred_element_type=f32) + bq
        k = jnp.einsum('hsd,hde->hse', x_h, wk, preferred_element_type=f32) + bk
        v = jnp.einsum('hsd,hde->hse', x_h, wv, preferred_element_type=f32) + bv

        # ---- scaled dot-product attention, batched over heads ----
        q_c = (q * scale).astype(cd)
        k_c = k.astype(cd)
        s = jnp.einsum('hqd,hkd->hqk', q_c, k_c,
                       preferred_element_type=f32)              # (H, S, S)
        s = s - jnp.max(s, axis=-1, keepdims=True)
        p = jnp.exp(s)
        p = p * pl.reciprocal(jnp.sum(p, axis=-1, keepdims=True), approx=True)

        ctx = jnp.einsum('hqk,hkd->hqd', p.astype(cd), v.astype(cd),
                         preferred_element_type=f32)            # (H, S, dk)

        # ---- output projection: sum_h ctx_h @ Wo_h  (no lane concat) ----
        attn = jnp.einsum('hsd,hdf->hsf', ctx.astype(cd), wo,
                          preferred_element_type=f32)           # (H, S, D)
        attn = jnp.sum(attn, axis=0) + bo                       # (S, D)

        # ---- residual + norm1 (dropout = identity, eval mode) ----
        y = layernorm(x + attn, g1, be1)

        # ---- Feed-forward: Linear -> ReLU -> Linear ----
        hidden = jnp.dot(y.astype(cd), w1, preferred_element_type=f32) + b1
        hidden = jnp.maximum(hidden, 0.0)
        ff = jnp.dot(hidden.astype(cd), w2, preferred_element_type=f32) + b2

        # ---- residual + norm2 ----
        out = layernorm(y + ff, g2, be2)
        o_ref[bb] = out.astype(o_ref.dtype)


def encoder_layer_forward(src, params, n_heads, *, batch_block=None,
                          compute_dtype=jnp.bfloat16, eps=1e-5):
    """src: (B, S, D) float32; params: dict of weights in (in, out) layout."""
    B, S, D = src.shape
    Dff = params["w1"].shape[1]
    assert D % n_heads == 0
    d_k = D // n_heads

    if batch_block is None:
        batch_block = 2 if (B % 2 == 0) else 1
    assert B % batch_block == 0
    grid = (B // batch_block,)

    cd = compute_dtype

    # Head-split the attention weights OUTSIDE the kernel (free in XLA); this
    # avoids lane-splitting reshapes / per-head lane slices inside the kernel.
    def split_w(w):   # (D, D) -> (H, D, dk): [h] = W[:, h*dk:(h+1)*dk]
        return jnp.transpose(w.reshape(D, n_heads, d_k), (1, 0, 2)).astype(cd)

    def split_b(b):   # (1, D) -> (H, 1, dk)
        return jnp.transpose(b.reshape(1, n_heads, d_k), (1, 0, 2))

    wq_h, wk_h, wv_h = split_w(params["wq"]), split_w(params["wk"]), split_w(params["wv"])
    bq_h, bk_h, bv_h = split_b(params["bq"]), split_b(params["bk"]), split_b(params["bv"])
    wo_h = params["wo"].reshape(n_heads, d_k, D).astype(cd)   # [h] = Wo[h*dk:(h+1)*dk, :]
    w1 = params["w1"].astype(cd)
    w2 = params["w2"].astype(cd)
    bo, b1, b2 = params["bo"], params["b1"], params["b2"]
    g1, be1, g2, be2 = params["g1"], params["be1"], params["g2"], params["be2"]

    def rep(shape):   # full-array block, constant block index
        return pl.BlockSpec(shape, lambda b, _n=len(shape): (0,) * _n)

    in_specs = [
        pl.BlockSpec((batch_block, S, D), lambda b: (b, 0, 0)),     # src
        rep((n_heads, D, d_k)), rep((n_heads, 1, d_k)),             # wq, bq
        rep((n_heads, D, d_k)), rep((n_heads, 1, d_k)),             # wk, bk
        rep((n_heads, D, d_k)), rep((n_heads, 1, d_k)),             # wv, bv
        rep((n_heads, d_k, D)), rep((1, D)),                        # wo, bo
        rep((D, Dff)), rep((1, Dff)),                               # w1, b1
        rep((Dff, D)), rep((1, D)),                                 # w2, b2
        rep((1, D)), rep((1, D)), rep((1, D)), rep((1, D)),         # norm1/2
    ]

    # Advisory cost estimate for the XLA scheduler.
    flops_per_b = (3 * 2 * S * D * D       # q, k, v projections
                   + 2 * 2 * S * S * D     # scores + attn @ V (all heads)
                   + 2 * S * D * D         # output projection
                   + 2 * 2 * S * D * Dff)  # FFN
    transc_per_b = n_heads * S * S + 2 * S
    weight_args = (wq_h, bq_h, wk_h, bk_h, wv_h, bv_h, wo_h, bo,
                   w1, b1, w2, b2, g1, be1, g2, be2)
    weight_bytes = sum(int(a.size) * a.dtype.itemsize for a in weight_args)
    bytes_accessed = (2 * B * S * D * src.dtype.itemsize
                      + grid[0] * weight_bytes)
    cost = pl.CostEstimate(flops=B * flops_per_b,
                           transcendentals=B * transc_per_b,
                           bytes_accessed=bytes_accessed)

    kernel = partial(_encoder_layer_kernel, n_heads, d_k, eps, cd)

    return pl.pallas_call(
        kernel,
        out_shape=jax.ShapeDtypeStruct((B, S, D), src.dtype),
        grid_spec=pltpu.PrefetchScalarGridSpec(
            num_scalar_prefetch=0,
            grid=grid,
            in_specs=in_specs,
            out_specs=pl.BlockSpec((batch_block, S, D), lambda b: (b, 0, 0)),
        ),
        compiler_params=pltpu.CompilerParams(
            dimension_semantics=("parallel",),
            vmem_limit_bytes=48 * 1024 * 1024),
        cost_estimate=cost,
    )(src, *weight_args)


def _reference_forward(src, params, n_heads):
    """Pure-JAX fp32 reference for sanity checking."""
    B, S, D = src.shape
    d_k = D // n_heads

    def lin(x, w, b):
        return x @ w + b

    def ln(x, g, b):
        mu = jnp.mean(x, axis=-1, keepdims=True)
        var = jnp.mean((x - mu) ** 2, axis=-1, keepdims=True)
        return (x - mu) / jnp.sqrt(var + 1e-5) * g + b

    q = lin(src, params["wq"], params["bq"]).reshape(B, S, n_heads, d_k).transpose(0, 2, 1, 3)
    k = lin(src, params["wk"], params["bk"]).reshape(B, S, n_heads, d_k).transpose(0, 2, 1, 3)
    v = lin(src, params["wv"], params["bv"]).reshape(B, S, n_heads, d_k).transpose(0, 2, 1, 3)
    s = jnp.einsum("bhqd,bhkd->bhqk", q, k) / math.sqrt(d_k)
    p = jax.nn.softmax(s, axis=-1)
    ctx = jnp.einsum("bhqk,bhkd->bhqd", p, v).transpose(0, 2, 1, 3).reshape(B, S, D)
    attn_out = lin(ctx, params["wo"], params["bo"])
    y = ln(src + attn_out, params["g1"], params["be1"])
    ff = lin(jnp.maximum(lin(y, params["w1"], params["b1"]), 0.0), params["w2"], params["b2"])
    return ln(y + ff, params["g2"], params["be2"])


def make_params(key, d_model, dim_feedforward):
    ks = jax.random.split(key, 8)
    scale_d = 1.0 / math.sqrt(d_model)
    scale_f = 1.0 / math.sqrt(dim_feedforward)
    p = {
        "wq": jax.random.uniform(ks[0], (d_model, d_model), jnp.float32, -scale_d, scale_d),
        "wk": jax.random.uniform(ks[1], (d_model, d_model), jnp.float32, -scale_d, scale_d),
        "wv": jax.random.uniform(ks[2], (d_model, d_model), jnp.float32, -scale_d, scale_d),
        "wo": jax.random.uniform(ks[3], (d_model, d_model), jnp.float32, -scale_d, scale_d),
        "w1": jax.random.uniform(ks[4], (d_model, dim_feedforward), jnp.float32, -scale_d, scale_d),
        "w2": jax.random.uniform(ks[5], (dim_feedforward, d_model), jnp.float32, -scale_f, scale_f),
        "bq": jax.random.uniform(ks[6], (1, d_model), jnp.float32, -scale_d, scale_d),
        "bk": jnp.zeros((1, d_model), jnp.float32),
        "bv": jnp.zeros((1, d_model), jnp.float32),
        "bo": jnp.zeros((1, d_model), jnp.float32),
        "b1": jax.random.uniform(ks[7], (1, dim_feedforward), jnp.float32, -scale_d, scale_d),
        "b2": jnp.zeros((1, d_model), jnp.float32),
        "g1": jnp.ones((1, d_model), jnp.float32),
        "be1": jnp.zeros((1, d_model), jnp.float32),
        "g2": jnp.ones((1, d_model), jnp.float32),
        "be2": jnp.zeros((1, d_model), jnp.float32),
    }
    return p


if __name__ == "__main__":
    # Small shapes consistent with the module: batch=2, seq=8, d_model=32,
    # n_heads=4, dim_feedforward=64.
    B, S, D, H, DFF = 2, 8, 32, 4, 64

    key = jax.random.PRNGKey(0)
    k_x, k_p = jax.random.split(key)
    src = jax.random.normal(k_x, (B, S, D), jnp.float32)
    params = make_params(k_p, D, DFF)

    ref = _reference_forward(src, params, n_heads=H)

    # 1) f32 compute path: tight algorithmic check (approx reciprocal only).
    out_f32 = jax.block_until_ready(
        encoder_layer_forward(src, params, n_heads=H, compute_dtype=jnp.float32))
    assert out_f32.shape == (B, S, D)
    assert jnp.allclose(out_f32, ref, atol=1e-2, rtol=1e-2), "f32 path mismatch vs JAX reference"

    # 2) bf16 MXU path (production config): tolerance widened for bf16
    #    operand rounding (~1e-3 relative per matmul).
    out_bf16 = jax.block_until_ready(
        encoder_layer_forward(src, params, n_heads=H, compute_dtype=jnp.bfloat16))
    assert out_bf16.shape == (B, S, D)
    assert jnp.allclose(out_bf16, ref, atol=5e-2, rtol=5e-2), "bf16 path mismatch vs JAX reference"

    print("KERNEL_OK")
</pallas_src>

<mosaic_0001>
module attributes {stable_mosaic.version = 11 : i64} {
  func.func @_encoder_layer_kernel(%arg0: i32, %arg1: memref<2x8x32xf32, #tpu.memory_space<vmem>>, %arg2: memref<4x32x8xf32, #tpu.memory_space<vmem>>, %arg3: memref<4x1x8xf32, #tpu.memory_space<vmem>>, %arg4: memref<4x32x8xf32, #tpu.memory_space<vmem>>, %arg5: memref<4x1x8xf32, #tpu.memory_space<vmem>>, %arg6: memref<4x32x8xf32, #tpu.memory_space<vmem>>, %arg7: memref<4x1x8xf32, #tpu.memory_space<vmem>>, %arg8: memref<4x8x32xf32, #tpu.memory_space<vmem>>, %arg9: memref<1x32xf32, #tpu.memory_space<vmem>>, %arg10: memref<32x64xf32, #tpu.memory_space<vmem>>, %arg11: memref<1x64xf32, #tpu.memory_space<vmem>>, %arg12: memref<64x32xf32, #tpu.memory_space<vmem>>, %arg13: memref<1x32xf32, #tpu.memory_space<vmem>>, %arg14: memref<1x32xf32, #tpu.memory_space<vmem>>, %arg15: memref<1x32xf32, #tpu.memory_space<vmem>>, %arg16: memref<1x32xf32, #tpu.memory_space<vmem>>, %arg17: memref<1x32xf32, #tpu.memory_space<vmem>>, %arg18: memref<2x8x32xf32, #tpu.memory_space<vmem>>) attributes {dimension_semantics = [#tpu.dimension_semantics<parallel>], iteration_bounds = array<i64: 1>, scalar_prefetch = 0 : i64, scratch_operands = 0 : i64, tpu.core_type = #tpu.core_type<tc>, window_params = [{transform_indices = @transform_0, window_bounds = array<i64: 2, 8, 32>}, {pipeline_mode = #tpu.pipeline_mode<synchronous>, transform_indices = @transform_1, window_bounds = array<i64: 4, 32, 8>}, {pipeline_mode = #tpu.pipeline_mode<synchronous>, transform_indices = @transform_2, window_bounds = array<i64: 4, 1, 8>}, {pipeline_mode = #tpu.pipeline_mode<synchronous>, transform_indices = @transform_3, window_bounds = array<i64: 4, 32, 8>}, {pipeline_mode = #tpu.pipeline_mode<synchronous>, transform_indices = @transform_4, window_bounds = array<i64: 4, 1, 8>}, {pipeline_mode = #tpu.pipeline_mode<synchronous>, transform_indices = @transform_5, window_bounds = array<i64: 4, 32, 8>}, {pipeline_mode = #tpu.pipeline_mode<synchronous>, transform_indices = @transform_6, window_bounds = array<i64: 4, 1, 8>}, {pipeline_mode = #tpu.pipeline_mode<synchronous>, transform_indices = @transform_7, window_bounds = array<i64: 4, 8, 32>}, {pipeline_mode = #tpu.pipeline_mode<synchronous>, transform_indices = @transform_8, window_bounds = array<i64: 1, 32>}, {pipeline_mode = #tpu.pipeline_mode<synchronous>, transform_indices = @transform_9, window_bounds = array<i64: 32, 64>}, {pipeline_mode = #tpu.pipeline_mode<synchronous>, transform_indices = @transform_10, window_bounds = array<i64: 1, 64>}, {pipeline_mode = #tpu.pipeline_mode<synchronous>, transform_indices = @transform_11, window_bounds = array<i64: 64, 32>}, {pipeline_mode = #tpu.pipeline_mode<synchronous>, transform_indices = @transform_12, window_bounds = array<i64: 1, 32>}, {pipeline_mode = #tpu.pipeline_mode<synchronous>, transform_indices = @transform_13, window_bounds = array<i64: 1, 32>}, {pipeline_mode = #tpu.pipeline_mode<synchronous>, transform_indices = @transform_14, window_bounds = array<i64: 1, 32>}, {pipeline_mode = #tpu.pipeline_mode<synchronous>, transform_indices = @transform_15, window_bounds = array<i64: 1, 32>}, {pipeline_mode = #tpu.pipeline_mode<synchronous>, transform_indices = @transform_16, window_bounds = array<i64: 1, 32>}, {transform_indices = @transform_17, window_bounds = array<i64: 2, 8, 32>}]} {
    %c0 = arith.constant 0 : index
    %c0_0 = arith.constant 0 : index
    %c0_1 = arith.constant 0 : index
    %0 = vector.load %arg2[%c0, %c0_0, %c0_1] : memref<4x32x8xf32, #tpu.memory_space<vmem>>, vector<4x32x8xf32>
    %c0_2 = arith.constant 0 : index
    %c0_3 = arith.constant 0 : index
    %c0_4 = arith.constant 0 : index
    %1 = vector.load %arg4[%c0_2, %c0_3, %c0_4] : memref<4x32x8xf32, #tpu.memory_space<vmem>>, vector<4x32x8xf32>
    %c0_5 = arith.constant 0 : index
    %c0_6 = arith.constant 0 : index
    %c0_7 = arith.constant 0 : index
    %2 = vector.load %arg6[%c0_5, %c0_6, %c0_7] : memref<4x32x8xf32, #tpu.memory_space<vmem>>, vector<4x32x8xf32>
    %c0_8 = arith.constant 0 : index
    %c0_9 = arith.constant 0 : index
    %c0_10 = arith.constant 0 : index
    %3 = vector.load %arg8[%c0_8, %c0_9, %c0_10] : memref<4x8x32xf32, #tpu.memory_space<vmem>>, vector<4x8x32xf32>
    %c0_11 = arith.constant 0 : index
    %c0_12 = arith.constant 0 : index
    %4 = vector.load %arg10[%c0_11, %c0_12] : memref<32x64xf32, #tpu.memory_space<vmem>>, vector<32x64xf32>
    %c0_13 = arith.constant 0 : index
    %c0_14 = arith.constant 0 : index
    %5 = vector.load %arg12[%c0_13, %c0_14] : memref<64x32xf32, #tpu.memory_space<vmem>>, vector<64x32xf32>
    %c0_15 = arith.constant 0 : index
    %c0_16 = arith.constant 0 : index
    %c0_17 = arith.constant 0 : index
    %6 = vector.load %arg3[%c0_15, %c0_16, %c0_17] : memref<4x1x8xf32, #tpu.memory_space<vmem>>, vector<4x1x8xf32>
    %c0_18 = arith.constant 0 : index
    %c0_19 = arith.constant 0 : index
    %c0_20 = arith.constant 0 : index
    %7 = vector.load %arg5[%c0_18, %c0_19, %c0_20] : memref<4x1x8xf32, #tpu.memory_space<vmem>>, vector<4x1x8xf32>
    %c0_21 = arith.constant 0 : index
    %c0_22 = arith.constant 0 : index
    %c0_23 = arith.constant 0 : index
    %8 = vector.load %arg7[%c0_21, %c0_22, %c0_23] : memref<4x1x8xf32, #tpu.memory_space<vmem>>, vector<4x1x8xf32>
    %c0_24 = arith.constant 0 : index
    %c0_25 = arith.constant 0 : index
    %9 = vector.load %arg9[%c0_24, %c0_25] : memref<1x32xf32, #tpu.memory_space<vmem>>, vector<1x32xf32>
    %c0_26 = arith.constant 0 : index
    %c0_27 = arith.constant 0 : index
    %10 = vector.load %arg11[%c0_26, %c0_27] : memref<1x64xf32, #tpu.memory_space<vmem>>, vector<1x64xf32>
    %c0_28 = arith.constant 0 : index
    %c0_29 = arith.constant 0 : index
    %11 = vector.load %arg13[%c0_28, %c0_29] : memref<1x32xf32, #tpu.memory_space<vmem>>, vector<1x32xf32>
    %c0_30 = arith.constant 0 : index
    %c0_31 = arith.constant 0 : index
    %12 = vector.load %arg14[%c0_30, %c0_31] : memref<1x32xf32, #tpu.memory_space<vmem>>, vector<1x32xf32>
    %c0_32 = arith.constant 0 : index
    %c0_33 = arith.constant 0 : index
    %13 = vector.load %arg15[%c0_32, %c0_33] : memref<1x32xf32, #tpu.memory_space<vmem>>, vector<1x32xf32>
    %c0_34 = arith.constant 0 : index
    %c0_35 = arith.constant 0 : index
    %14 = vector.load %arg16[%c0_34, %c0_35] : memref<1x32xf32, #tpu.memory_space<vmem>>, vector<1x32xf32>
    %c0_36 = arith.constant 0 : index
    %c0_37 = arith.constant 0 : index
    %15 = vector.load %arg17[%c0_36, %c0_37] : memref<1x32xf32, #tpu.memory_space<vmem>>, vector<1x32xf32>
    %c0_38 = arith.constant 0 : index
    %c0_39 = arith.constant 0 : index
    %c0_40 = arith.constant 0 : index
    %16 = vector.load %arg1[%c0_38, %c0_39, %c0_40] : memref<2x8x32xf32, #tpu.memory_space<vmem>>, vector<1x8x32xf32>
    %17 = vector.shape_cast %16 : vector<1x8x32xf32> to vector<8x32xf32>
    %18 = vector.shape_cast %17 : vector<8x32xf32> to vector<1x8x32xf32>
    %19 = vector.broadcast %18 : vector<1x8x32xf32> to vector<4x8x32xf32>
    "tpu.trace_start"() <{level = 10 : i32, message = "hsd,hde->hse"}> : () -> ()
    %cst = arith.constant dense<0.000000e+00> : vector<4x8x8xf32>
    %20 = tpu.matmul %19, %0, %cst {dimension_numbers = #tpu.dot_dimension_numbers<[2], [1], [1], [2], [0, 0, 0, 1, 1, 2], [0], [0]>} : vector<4x8x32xf32>, vector<4x32x8xf32>, vector<4x8x8xf32> -> vector<4x8x8xf32>
    "tpu.trace_stop"() : () -> ()
    %21 = vector.broadcast %6 : vector<4x1x8xf32> to vector<4x8x8xf32>
    %22 = arith.addf %20, %21 : vector<4x8x8xf32>
    "tpu.trace_start"() <{level = 10 : i32, message = "hsd,hde->hse"}> : () -> ()
    %cst_41 = arith.constant dense<0.000000e+00> : vector<4x8x8xf32>
    %23 = tpu.matmul %19, %1, %cst_41 {dimension_numbers = #tpu.dot_dimension_numbers<[2], [1], [1], [2], [0, 0, 0, 1, 1, 2], [0], [0]>} : vector<4x8x32xf32>, vector<4x32x8xf32>, vector<4x8x8xf32> -> vector<4x8x8xf32>
    "tpu.trace_stop"() : () -> ()
    %24 = vector.broadcast %7 : vector<4x1x8xf32> to vector<4x8x8xf32>
    %25 = arith.addf %23, %24 : vector<4x8x8xf32>
    "tpu.trace_start"() <{level = 10 : i32, message = "hsd,hde->hse"}> : () -> ()
    %cst_42 = arith.constant dense<0.000000e+00> : vector<4x8x8xf32>
    %26 = tpu.matmul %19, %2, %cst_42 {dimension_numbers = #tpu.dot_dimension_numbers<[2], [1], [1], [2], [0, 0, 0, 1, 1, 2], [0], [0]>} : vector<4x8x32xf32>, vector<4x32x8xf32>, vector<4x8x8xf32> -> vector<4x8x8xf32>
    "tpu.trace_stop"() : () -> ()
    %27 = vector.broadcast %8 : vector<4x1x8xf32> to vector<4x8x8xf32>
    %28 = arith.addf %26, %27 : vector<4x8x8xf32>
    %cst_43 = arith.constant 0.353553385 : f32
    %29 = vector.broadcast %cst_43 : f32 to vector<4x8x8xf32>
    %30 = arith.mulf %22, %29 : vector<4x8x8xf32>
    "tpu.trace_start"() <{level = 10 : i32, message = "hqd,hkd->hqk"}> : () -> ()
    %cst_44 = arith.constant dense<0.000000e+00> : vector<4x8x8xf32>
    %31 = tpu.matmul %30, %25, %cst_44 {dimension_numbers = #tpu.dot_dimension_numbers<[2], [2], [1], [1], [0, 0, 0, 1, 1, 1], [0], [0]>} : vector<4x8x8xf32>, vector<4x8x8xf32>, vector<4x8x8xf32> -> vector<4x8x8xf32>
    "tpu.trace_stop"() : () -> ()
    %cst_45 = arith.constant dense<0xFF800000> : vector<4x8xf32>
    %32 = vector.multi_reduction <maximumf>, %31, %cst_45 [2] : vector<4x8x8xf32> to vector<4x8xf32>
    %33 = vector.shape_cast %32 : vector<4x8xf32> to vector<4x8x1xf32>
    %34 = vector.broadcast %33 : vector<4x8x1xf32> to vector<4x8x8xf32>
    %35 = arith.subf %31, %34 : vector<4x8x8xf32>
    %36 = math.exp %35 : vector<4x8x8xf32>
    %cst_46 = arith.constant dense<0.000000e+00> : vector<4x8xf32>
    %37 = vector.multi_reduction <add>, %36, %cst_46 [2] : vector<4x8x8xf32> to vector<4x8xf32>
    %38 = vector.shape_cast %37 : vector<4x8xf32> to vector<4x8x1xf32>
    %39 = tpu.reciprocal %38 {approx = true} : vector<4x8x1xf32> -> vector<4x8x1xf32>
    %40 = vector.broadcast %39 : vector<4x8x1xf32> to vector<4x8x8xf32>
    %41 = arith.mulf %36, %40 : vector<4x8x8xf32>
    "tpu.trace_start"() <{level = 10 : i32, message = "hqk,hkd->hqd"}> : () -> ()
    %cst_47 = arith.constant dense<0.000000e+00> : vector<4x8x8xf32>
    %42 = tpu.matmul %41, %28, %cst_47 {dimension_numbers = #tpu.dot_dimension_numbers<[2], [1], [1], [2], [0, 0, 0, 1, 1, 2], [0], [0]>} : vector<4x8x8xf32>, vector<4x8x8xf32>, vector<4x8x8xf32> -> vector<4x8x8xf32>
    "tpu.trace_stop"() : () -> ()
    "tpu.trace_start"() <{level = 10 : i32, message = "hsd,hdf->hsf"}> : () -> ()
    %cst_48 = arith.constant dense<0.000000e+00> : vector<4x8x32xf32>
    %43 = tpu.matmul %42, %3, %cst_48 {dimension_numbers = #tpu.dot_dimension_numbers<[2], [1], [1], [2], [0, 0, 0, 1, 1, 2], [0], [0]>} : vector<4x8x8xf32>, vector<4x8x32xf32>, vector<4x8x32xf32> -> vector<4x8x32xf32>
    "tpu.trace_stop"() : () -> ()
    %cst_49 = arith.constant dense<0.000000e+00> : vector<8x32xf32>
    %44 = vector.multi_reduction <add>, %43, %cst_49 [0] : vector<4x8x32xf32> to vector<8x32xf32>
    %45 = vector.broadcast %9 : vector<1x32xf32> to vector<8x32xf32>
    %46 = arith.addf %44, %45 : vector<8x32xf32>
    %47 = arith.addf %17, %46 : vector<8x32xf32>
    %cst_50 = arith.constant dense<0.000000e+00> : vector<8xf32>
    %48 = vector.multi_reduction <add>, %47, %cst_50 [1] : vector<8x32xf32> to vector<8xf32>
    %49 = vector.shape_cast %48 : vector<8xf32> to vector<8x1xf32>
    %cst_51 = arith.constant 3.200000e+01 : f32
    %50 = vector.broadcast %cst_51 : f32 to vector<8x1xf32>
    %51 = arith.divf %49, %50 : vector<8x1xf32>
    %52 = vector.broadcast %51 : vector<8x1xf32> to vector<8x32xf32>
    %53 = arith.subf %47, %52 : vector<8x32xf32>
    %54 = arith.mulf %53, %53 : vector<8x32xf32>
    %cst_52 = arith.constant dense<0.000000e+00> : vector<8xf32>
    %55 = vector.multi_reduction <add>, %54, %cst_52 [1] : vector<8x32xf32> to vector<8xf32>
    %56 = vector.shape_cast %55 : vector<8xf32> to vector<8x1xf32>
    %cst_53 = arith.constant 3.200000e+01 : f32
    %57 = vector.broadcast %cst_53 : f32 to vector<8x1xf32>
    %58 = arith.divf %56, %57 : vector<8x1xf32>
    %59 = vector.broadcast %51 : vector<8x1xf32> to vector<8x32xf32>
    %60 = arith.subf %47, %59 : vector<8x32xf32>
    %cst_54 = arith.constant 9.99999974E-6 : f32
    %61 = vector.broadcast %cst_54 : f32 to vector<8x1xf32>
    %62 = arith.addf %58, %61 : vector<8x1xf32>
    %63 = math.rsqrt %62 : vector<8x1xf32>
    %64 = vector.broadcast %63 : vector<8x1xf32> to vector<8x32xf32>
    %65 = arith.mulf %60, %64 : vector<8x32xf32>
    %66 = vector.broadcast %12 : vector<1x32xf32> to vector<8x32xf32>
    %67 = arith.mulf %65, %66 : vector<8x32xf32>
    %68 = vector.broadcast %13 : vector<1x32xf32> to vector<8x32xf32>
    %69 = arith.addf %67, %68 : vector<8x32xf32>
    %cst_55 = arith.constant dense<0.000000e+00> : vector<8x64xf32>
    %70 = tpu.matmul %69, %4, %cst_55 {dimension_numbers = #tpu.dot_dimension_numbers<[1], [0], [0], [1], [0, 0, 1, 1], [], []>} : vector<8x32xf32>, vector<32x64xf32>, vector<8x64xf32> -> vector<8x64xf32>
    %71 = vector.broadcast %10 : vector<1x64xf32> to vector<8x64xf32>
    %72 = arith.addf %70, %71 : vector<8x64xf32>
    %cst_56 = arith.constant 0.000000e+00 : f32
    %73 = vector.broadcast %cst_56 : f32 to vector<8x64xf32>
    %74 = arith.maximumf %72, %73 : vector<8x64xf32>
    %cst_57 = arith.constant dense<0.000000e+00> : vector<8x32xf32>
    %75 = tpu.matmul %74, %5, %cst_57 {dimension_numbers = #tpu.dot_dimension_numbers<[1], [0], [0], [1], [0, 0, 1, 1], [], []>} : vector<8x64xf32>, vector<64x32xf32>, vector<8x32xf32> -> vector<8x32xf32>
    %76 = vector.broadcast %11 : vector<1x32xf32> to vector<8x32xf32>
    %77 = arith.addf %75, %76 : vector<8x32xf32>
    %78 = arith.addf %69, %77 : vector<8x32xf32>
    %cst_58 = arith.constant dense<0.000000e+00> : vector<8xf32>
    %79 = vector.multi_reduction <add>, %78, %cst_58 [1] : vector<8x32xf32> to vector<8xf32>
    %80 = vector.shape_cast %79 : vector<8xf32> to vector<8x1xf32>
    %cst_59 = arith.constant 3.200000e+01 : f32
    %81 = vector.broadcast %cst_59 : f32 to vector<8x1xf32>
    %82 = arith.divf %80, %81 : vector<8x1xf32>
    %83 = vector.broadcast %82 : vector<8x1xf32> to vector<8x32xf32>
    %84 = arith.subf %78, %83 : vector<8x32xf32>
    %85 = arith.mulf %84, %84 : vector<8x32xf32>
    %cst_60 = arith.constant dense<0.000000e+00> : vector<8xf32>
    %86 = vector.multi_reduction <add>, %85, %cst_60 [1] : vector<8x32xf32> to vector<8xf32>
    %87 = vector.shape_cast %86 : vector<8xf32> to vector<8x1xf32>
    %cst_61 = arith.constant 3.200000e+01 : f32
    %88 = vector.broadcast %cst_61 : f32 to vector<8x1xf32>
    %89 = arith.divf %87, %88 : vector<8x1xf32>
    %90 = vector.broadcast %82 : vector<8x1xf32> to vector<8x32xf32>
    %91 = arith.subf %78, %90 : vector<8x32xf32>
    %cst_62 = arith.constant 9.99999974E-6 : f32
    %92 = vector.broadcast %cst_62 : f32 to vector<8x1xf32>
    %93 = arith.addf %89, %92 : vector<8x1xf32>
    %94 = math.rsqrt %93 : vector<8x1xf32>
    %95 = vector.broadcast %94 : vector<8x1xf32> to vector<8x32xf32>
    %96 = arith.mulf %91, %95 : vector<8x32xf32>
    %97 = vector.broadcast %14 : vector<1x32xf32> to vector<8x32xf32>
    %98 = arith.mulf %96, %97 : vector<8x32xf32>
    %99 = vector.broadcast %15 : vector<1x32xf32> to vector<8x32xf32>
    %100 = arith.addf %98, %99 : vector<8x32xf32>
    %c0_63 = arith.constant 0 : index
    %c0_64 = arith.constant 0 : index
    %c0_65 = arith.constant 0 : index
    %101 = vector.load %arg18[%c0_63, %c0_64, %c0_65] : memref<2x8x32xf32, #tpu.memory_space<vmem>>, vector<1x8x32xf32>
    %102 = vector.shape_cast %101 : vector<1x8x32xf32> to vector<8x32xf32>
    %103 = vector.shape_cast %100 : vector<8x32xf32> to vector<1x8x32xf32>
    tpu.vector_store %arg18[%c0_63, %c0_64, %c0_65], %103 {strides = array<i32>} : memref<2x8x32xf32, #tpu.memory_space<vmem>>, vector<1x8x32xf32>,
    %c1 = arith.constant 1 : index
    %c0_66 = arith.constant 0 : index
    %c0_67 = arith.constant 0 : index
    %104 = vector.load %arg1[%c1, %c0_66, %c0_67] : memref<2x8x32xf32, #tpu.memory_space<vmem>>, vector<1x8x32xf32>
    %105 = vector.shape_cast %104 : vector<1x8x32xf32> to vector<8x32xf32>
    %106 = vector.shape_cast %105 : vector<8x32xf32> to vector<1x8x32xf32>
    %107 = vector.broadcast %106 : vector<1x8x32xf32> to vector<4x8x32xf32>
    "tpu.trace_start"() <{level = 10 : i32, message = "hsd,hde->hse"}> : () -> ()
    %cst_68 = arith.constant dense<0.000000e+00> : vector<4x8x8xf32>
    %108 = tpu.matmul %107, %0, %cst_68 {dimension_numbers = #tpu.dot_dimension_numbers<[2], [1], [1], [2], [0, 0, 0, 1, 1, 2], [0], [0]>} : vector<4x8x32xf32>, vector<4x32x8xf32>, vector<4x8x8xf32> -> vector<4x8x8xf32>
    "tpu.trace_stop"() : () -> ()
    %109 = vector.broadcast %6 : vector<4x1x8xf32> to vector<4x8x8xf32>
    %110 = arith.addf %108, %109 : vector<4x8x8xf32>
    "tpu.trace_start"() <{level = 10 : i32, message = "hsd,hde->hse"}> : () -> ()
    %cst_69 = arith.constant dense<0.000000e+00> : vector<4x8x8xf32>
    %111 = tpu.matmul %107, %1, %cst_69 {dimension_numbers = #tpu.dot_dimension_numbers<[2], [1], [1], [2], [0, 0, 0, 1, 1, 2], [0], [0]>} : vector<4x8x32xf32>, vector<4x32x8xf32>, vector<4x8x8xf32> -> vector<4x8x8xf32>
    "tpu.trace_stop"() : () -> ()
    %112 = vector.broadcast %7 : vector<4x1x8xf32> to vector<4x8x8xf32>
    %113 = arith.addf %111, %112 : vector<4x8x8xf32>
    "tpu.trace_start"() <{level = 10 : i32, message = "hsd,hde->hse"}> : () -> ()
    %cst_70 = arith.constant dense<0.000000e+00> : vector<4x8x8xf32>
    %114 = tpu.matmul %107, %2, %cst_70 {dimension_numbers = #tpu.dot_dimension_numbers<[2], [1], [1], [2], [0, 0, 0, 1, 1, 2], [0], [0]>} : vector<4x8x32xf32>, vector<4x32x8xf32>, vector<4x8x8xf32> -> vector<4x8x8xf32>
    "tpu.trace_stop"() : () -> ()
    %115 = vector.broadcast %8 : vector<4x1x8xf32> to vector<4x8x8xf32>
    %116 = arith.addf %114, %115 : vector<4x8x8xf32>
    %cst_71 = arith.constant 0.353553385 : f32
    %117 = vector.broadcast %cst_71 : f32 to vector<4x8x8xf32>
    %118 = arith.mulf %110, %117 : vector<4x8x8xf32>
    "tpu.trace_start"() <{level = 10 : i32, message = "hqd,hkd->hqk"}> : () -> ()
    %cst_72 = arith.constant dense<0.000000e+00> : vector<4x8x8xf32>
    %119 = tpu.matmul %118, %113, %cst_72 {dimension_numbers = #tpu.dot_dimension_numbers<[2], [2], [1], [1], [0, 0, 0, 1, 1, 1], [0], [0]>} : vector<4x8x8xf32>, vector<4x8x8xf32>, vector<4x8x8xf32> -> vector<4x8x8xf32>
    "tpu.trace_stop"() : () -> ()
    %cst_73 = arith.constant dense<0xFF800000> : vector<4x8xf32>
    %120 = vector.multi_reduction <maximumf>, %119, %cst_73 [2] : vector<4x8x8xf32> to vector<4x8xf32>
    %121 = vector.shape_cast %120 : vector<4x8xf32> to vector<4x8x1xf32>
    %122 = vector.broadcast %121 : vector<4x8x1xf32> to vector<4x8x8xf32>
    %123 = arith.subf %119, %122 : vector<4x8x8xf32>
    %124 = math.exp %123 : vector<4x8x8xf32>
    %cst_74 = arith.constant dense<0.000000e+00> : vector<4x8xf32>
    %125 = vector.multi_reduction <add>, %124, %cst_74 [2] : vector<4x8x8xf32> to vector<4x8xf32>
    %126 = vector.shape_cast %125 : vector<4x8xf32> to vector<4x8x1xf32>
    %127 = tpu.reciprocal %126 {approx = true} : vector<4x8x1xf32> -> vector<4x8x1xf32>
    %128 = vector.broadcast %127 : vector<4x8x1xf32> to vector<4x8x8xf32>
    %129 = arith.mulf %124, %128 : vector<4x8x8xf32>
    "tpu.trace_start"() <{level = 10 : i32, message = "hqk,hkd->hqd"}> : () -> ()
    %cst_75 = arith.constant dense<0.000000e+00> : vector<4x8x8xf32>
    %130 = tpu.matmul %129, %116, %cst_75 {dimension_numbers = #tpu.dot_dimension_numbers<[2], [1], [1], [2], [0, 0, 0, 1, 1, 2], [0], [0]>} : vector<4x8x8xf32>, vector<4x8x8xf32>, vector<4x8x8xf32> -> vector<4x8x8xf32>
    "tpu.trace_stop"() : () -> ()
    "tpu.trace_start"() <{level = 10 : i32, message = "hsd,hdf->hsf"}> : () -> ()
    %cst_76 = arith.constant dense<0.000000e+00> : vector<4x8x32xf32>
    %131 = tpu.matmul %130, %3, %cst_76 {dimension_numbers = #tpu.dot_dimension_numbers<[2], [1], [1], [2], [0, 0, 0, 1, 1, 2], [0], [0]>} : vector<4x8x8xf32>, vector<4x8x32xf32>, vector<4x8x32xf32> -> vector<4x8x32xf32>
    "tpu.trace_stop"() : () -> ()
    %cst_77 = arith.constant dense<0.000000e+00> : vector<8x32xf32>
    %132 = vector.multi_reduction <add>, %131, %cst_77 [0] : vector<4x8x32xf32> to vector<8x32xf32>
    %133 = vector.broadcast %9 : vector<1x32xf32> to vector<8x32xf32>
    %134 = arith.addf %132, %133 : vector<8x32xf32>
    %135 = arith.addf %105, %134 : vector<8x32xf32>
    %cst_78 = arith.constant dense<0.000000e+00> : vector<8xf32>
    %136 = vector.multi_reduction <add>, %135, %cst_78 [1] : vector<8x32xf32> to vector<8xf32>
    %137 = vector.shape_cast %136 : vector<8xf32> to vector<8x1xf32>
    %cst_79 = arith.constant 3.200000e+01 : f32
    %138 = vector.broadcast %cst_79 : f32 to vector<8x1xf32>
    %139 = arith.divf %137, %138 : vector<8x1xf32>
    %140 = vector.broadcast %139 : vector<8x1xf32> to vector<8x32xf32>
    %141 = arith.subf %135, %140 : vector<8x32xf32>
    %142 = arith.mulf %141, %141 : vector<8x32xf32>
    %cst_80 = arith.constant dense<0.000000e+00> : vector<8xf32>
    %143 = vector.multi_reduction <add>, %142, %cst_80 [1] : vector<8x32xf32> to vector<8xf32>
    %144 = vector.shape_cast %143 : vector<8xf32> to vector<8x1xf32>
    %cst_81 = arith.constant 3.200000e+01 : f32
    %145 = vector.broadcast %cst_81 : f32 to vector<8x1xf32>
    %146 = arith.divf %144, %145 : vector<8x1xf32>
    %147 = vector.broadcast %139 : vector<8x1xf32> to vector<8x32xf32>
    %148 = arith.subf %135, %147 : vector<8x32xf32>
    %cst_82 = arith.constant 9.99999974E-6 : f32
    %149 = vector.broadcast %cst_82 : f32 to vector<8x1xf32>
    %150 = arith.addf %146, %149 : vector<8x1xf32>
    %151 = math.rsqrt %150 : vector<8x1xf32>
    %152 = vector.broadcast %151 : vector<8x1xf32> to vector<8x32xf32>
    %153 = arith.mulf %148, %152 : vector<8x32xf32>
    %154 = vector.broadcast %12 : vector<1x32xf32> to vector<8x32xf32>
    %155 = arith.mulf %153, %154 : vector<8x32xf32>
    %156 = vector.broadcast %13 : vector<1x32xf32> to vector<8x32xf32>
    %157 = arith.addf %155, %156 : vector<8x32xf32>
    %cst_83 = arith.constant dense<0.000000e+00> : vector<8x64xf32>
    %158 = tpu.matmul %157, %4, %cst_83 {dimension_numbers = #tpu.dot_dimension_numbers<[1], [0], [0], [1], [0, 0, 1, 1], [], []>} : vector<8x32xf32>, vector<32x64xf32>, vector<8x64xf32> -> vector<8x64xf32>
    %159 = vector.broadcast %10 : vector<1x64xf32> to vector<8x64xf32>
    %160 = arith.addf %158, %159 : vector<8x64xf32>
    %cst_84 = arith.constant 0.000000e+00 : f32
    %161 = vector.broadcast %cst_84 : f32 to vector<8x64xf32>
    %162 = arith.maximumf %160, %161 : vector<8x64xf32>
    %cst_85 = arith.constant dense<0.000000e+00> : vector<8x32xf32>
    %163 = tpu.matmul %162, %5, %cst_85 {dimension_numbers = #tpu.dot_dimension_numbers<[1], [0], [0], [1], [0, 0, 1, 1], [], []>} : vector<8x64xf32>, vector<64x32xf32>, vector<8x32xf32> -> vector<8x32xf32>
    %164 = vector.broadcast %11 : vector<1x32xf32> to vector<8x32xf32>
    %165 = arith.addf %163, %164 : vector<8x32xf32>
    %166 = arith.addf %157, %165 : vector<8x32xf32>
    %cst_86 = arith.constant dense<0.000000e+00> : vector<8xf32>
    %167 = vector.multi_reduction <add>, %166, %cst_86 [1] : vector<8x32xf32> to vector<8xf32>
    %168 = vector.shape_cast %167 : vector<8xf32> to vector<8x1xf32>
    %cst_87 = arith.constant 3.200000e+01 : f32
    %169 = vector.broadcast %cst_87 : f32 to vector<8x1xf32>
    %170 = arith.divf %168, %169 : vector<8x1xf32>
    %171 = vector.broadcast %170 : vector<8x1xf32> to vector<8x32xf32>
    %172 = arith.subf %166, %171 : vector<8x32xf32>
    %173 = arith.mulf %172, %172 : vector<8x32xf32>
    %cst_88 = arith.constant dense<0.000000e+00> : vector<8xf32>
    %174 = vector.multi_reduction <add>, %173, %cst_88 [1] : vector<8x32xf32> to vector<8xf32>
    %175 = vector.shape_cast %174 : vector<8xf32> to vector<8x1xf32>
    %cst_89 = arith.constant 3.200000e+01 : f32
    %176 = vector.broadcast %cst_89 : f32 to vector<8x1xf32>
    %177 = arith.divf %175, %176 : vector<8x1xf32>
    %178 = vector.broadcast %170 : vector<8x1xf32> to vector<8x32xf32>
    %179 = arith.subf %166, %178 : vector<8x32xf32>
    %cst_90 = arith.constant 9.99999974E-6 : f32
    %180 = vector.broadcast %cst_90 : f32 to vector<8x1xf32>
    %181 = arith.addf %177, %180 : vector<8x1xf32>
    %182 = math.rsqrt %181 : vector<8x1xf32>
    %183 = vector.broadcast %182 : vector<8x1xf32> to vector<8x32xf32>
    %184 = arith.mulf %179, %183 : vector<8x32xf32>
    %185 = vector.broadcast %14 : vector<1x32xf32> to vector<8x32xf32>
    %186 = arith.mulf %184, %185 : vector<8x32xf32>
    %187 = vector.broadcast %15 : vector<1x32xf32> to vector<8x32xf32>
    %188 = arith.addf %186, %187 : vector<8x32xf32>
    %c1_91 = arith.constant 1 : index
    %c0_92 = arith.constant 0 : index
    %c0_93 = arith.constant 0 : index
    %189 = vector.load %arg18[%c1_91, %c0_92, %c0_93] : memref<2x8x32xf32, #tpu.memory_space<vmem>>, vector<1x8x32xf32>
    %190 = vector.shape_cast %189 : vector<1x8x32xf32> to vector<8x32xf32>
    %191 = vector.shape_cast %188 : vector<8x32xf32> to vector<1x8x32xf32>
    tpu.vector_store %arg18[%c1_91, %c0_92, %c0_93], %191 {strides = array<i32>} : memref<2x8x32xf32, #tpu.memory_space<vmem>>, vector<1x8x32xf32>,
    return
  }
  func.func @transform_0(%arg0: i32) -> (i32, i32, i32) {
    %c0_i32 = arith.constant 0 : i32
    %c0_i32_0 = arith.constant 0 : i32
    %c0_i32_1 = arith.constant 0 : i32
    return %arg0, %c0_i32, %c0_i32_0 : i32, i32, i32
  }
  func.func @transform_1(%arg0: i32) -> (i32, i32, i32) {
    %c0_i32 = arith.constant 0 : i32
    %c0_i32_0 = arith.constant 0 : i32
    %c0_i32_1 = arith.constant 0 : i32
    %c0_i32_2 = arith.constant 0 : i32
    return %c0_i32, %c0_i32_0, %c0_i32_1 : i32, i32, i32
  }
  func.func @transform_2(%arg0: i32) -> (i32, i32, i32) {
    %c0_i32 = arith.constant 0 : i32
    %c0_i32_0 = arith.constant 0 : i32
    %c0_i32_1 = arith.constant 0 : i32
    %c0_i32_2 = arith.constant 0 : i32
    return %c0_i32, %c0_i32_0, %c0_i32_1 : i32, i32, i32
  }
  func.func @transform_3(%arg0: i32) -> (i32, i32, i32) {
    %c0_i32 = arith.constant 0 : i32
    %c0_i32_0 = arith.constant 0 : i32
    %c0_i32_1 = arith.constant 0 : i32
    %c0_i32_2 = arith.constant 0 : i32
    return %c0_i32, %c0_i32_0, %c0_i32_1 : i32, i32, i32
  }
  func.func @transform_4(%arg0: i32) -> (i32, i32, i32) {
    %c0_i32 = arith.constant 0 : i32
    %c0_i32_0 = arith.constant 0 : i32
    %c0_i32_1 = arith.constant 0 : i32
    %c0_i32_2 = arith.constant 0 : i32
    return %c0_i32, %c0_i32_0, %c0_i32_1 : i32, i32, i32
  }
  func.func @transform_5(%arg0: i32) -> (i32, i32, i32) {
    %c0_i32 = arith.constant 0 : i32
    %c0_i32_0 = arith.constant 0 : i32
    %c0_i32_1 = arith.constant 0 : i32
    %c0_i32_2 = arith.constant 0 : i32
    return %c0_i32, %c0_i32_0, %c0_i32_1 : i32, i32, i32
  }
  func.func @transform_6(%arg0: i32) -> (i32, i32, i32) {
    %c0_i32 = arith.constant 0 : i32
    %c0_i32_0 = arith.constant 0 : i32
    %c0_i32_1 = arith.constant 0 : i32
    %c0_i32_2 = arith.constant 0 : i32
    return %c0_i32, %c0_i32_0, %c0_i32_1 : i32, i32, i32
  }
  func.func @transform_7(%arg0: i32) -> (i32, i32, i32) {
    %c0_i32 = arith.constant 0 : i32
    %c0_i32_0 = arith.constant 0 : i32
    %c0_i32_1 = arith.constant 0 : i32
    %c0_i32_2 = arith.constant 0 : i32
    return %c0_i32, %c0_i32_0, %c0_i32_1 : i32, i32, i32
  }
  func.func @transform_8(%arg0: i32) -> (i32, i32) {
    %c0_i32 = arith.constant 0 : i32
    %c0_i32_0 = arith.constant 0 : i32
    %c0_i32_1 = arith.constant 0 : i32
    return %c0_i32, %c0_i32_0 : i32, i32
  }
  func.func @transform_9(%arg0: i32) -> (i32, i32) {
    %c0_i32 = arith.constant 0 : i32
    %c0_i32_0 = arith.constant 0 : i32
    %c0_i32_1 = arith.constant 0 : i32
    return %c0_i32, %c0_i32_0 : i32, i32
  }
  func.func @transform_10(%arg0: i32) -> (i32, i32) {
    %c0_i32 = arith.constant 0 : i32
    %c0_i32_0 = arith.constant 0 : i32
    %c0_i32_1 = arith.constant 0 : i32
    return %c0_i32, %c0_i32_0 : i32, i32
  }
  func.func @transform_11(%arg0: i32) -> (i32, i32) {
    %c0_i32 = arith.constant 0 : i32
    %c0_i32_0 = arith.constant 0 : i32
    %c0_i32_1 = arith.constant 0 : i32
    return %c0_i32, %c0_i32_0 : i32, i32
  }
  func.func @transform_12(%arg0: i32) -> (i32, i32) {
    %c0_i32 = arith.constant 0 : i32
    %c0_i32_0 = arith.constant 0 : i32
    %c0_i32_1 = arith.constant 0 : i32
    return %c0_i32, %c0_i32_0 : i32, i32
  }
  func.func @transform_13(%arg0: i32) -> (i32, i32) {
    %c0_i32 = arith.constant 0 : i32
    %c0_i32_0 = arith.constant 0 : i32
    %c0_i32_1 = arith.constant 0 : i32
    return %c0_i32, %c0_i32_0 : i32, i32
  }
  func.func @transform_14(%arg0: i32) -> (i32, i32) {
    %c0_i32 = arith.constant 0 : i32
    %c0_i32_0 = arith.constant 0 : i32
    %c0_i32_1 = arith.constant 0 : i32
    return %c0_i32, %c0_i32_0 : i32, i32
  }
  func.func @transform_15(%arg0: i32) -> (i32, i32) {
    %c0_i32 = arith.constant 0 : i32
    %c0_i32_0 = arith.constant 0 : i32
    %c0_i32_1 = arith.constant 0 : i32
    return %c0_i32, %c0_i32_0 : i32, i32
  }
  func.func @transform_16(%arg0: i32) -> (i32, i32) {
    %c0_i32 = arith.constant 0 : i32
    %c0_i32_0 = arith.constant 0 : i32
    %c0_i32_1 = arith.constant 0 : i32
    return %c0_i32, %c0_i32_0 : i32, i32
  }
  func.func @transform_17(%arg0: i32) -> (i32, i32, i32) {
    %c0_i32 = arith.constant 0 : i32
    %c0_i32_0 = arith.constant 0 : i32
    %c0_i32_1 = arith.constant 0 : i32
    return %arg0, %c0_i32, %c0_i32_0 : i32, i32, i32
  }
}

</mosaic_0001>

<bundles_post_ra>
// kernel: tpu_custom_call.1
= control target key start
LH: loop header
LB: loop body
LE: loop exit
PB: predicated region body
PF: predicated region fallthrough
CT: control target
= control target key end

     0   :  { %s6063_s0 = inlined_call_operand.vmem [shape: f32[2,8,32], index: 0, kind: input, shape index: {}]   ;;  %s6064_s1 = inlined_call_operand.vmem [shape: f32[4,32,8], index: 1, kind: input, shape index: {}]   ;;  %s6065_s2 = inlined_call_operand.vmem [shape: f32[4,1,8], index: 2, kind: input, shape index: {}]   ;;  %s6066_s3 = inlined_call_operand.vmem [shape: f32[4,32,8], index: 3, kind: input, shape index: {}]   ;;  %s6067_s4 = inlined_call_operand.vmem [shape: f32[4,1,8], index: 4, kind: input, shape index: {}]   ;;  %s6068_s5 = inlined_call_operand.vmem [shape: f32[4,32,8], index: 5, kind: input, shape index: {}]   ;;  %s6069_s6 = inlined_call_operand.vmem [shape: f32[4,1,8], index: 6, kind: input, shape index: {}]   ;;  %s6070_s7 = inlined_call_operand.vmem [shape: f32[4,8,32], index: 7, kind: input, shape index: {}]   ;;  %s6071_s8 = inlined_call_operand.vmem [shape: f32[1,32], index: 8, kind: input, shape index: {}]   ;;  %s6072_s9 = inlined_call_operand.vmem [shape: f32[32,64], index: 9, kind: input, shape index: {}]   ;;  %s6073_s10 = inlined_call_operand.vmem [shape: f32[1,64], index: 10, kind: input, shape index: {}]   ;;  %s6074_s11 = inlined_call_operand.vmem [shape: f32[64,32], index: 11, kind: input, shape index: {}]   ;;  %s6075_s12 = inlined_call_operand.vmem [shape: f32[1,32], index: 12, kind: input, shape index: {}]   ;;  %s6076_s13 = inlined_call_operand.vmem [shape: f32[1,32], index: 13, kind: input, shape index: {}]   ;;  %s6077_s14 = inlined_call_operand.vmem [shape: f32[1,32], index: 14, kind: input, shape index: {}]   ;;  %s6078_s15 = inlined_call_operand.vmem [shape: f32[1,32], index: 15, kind: input, shape index: {}]   ;;  %s6079_s16 = inlined_call_operand.vmem [shape: f32[1,32], index: 16, kind: input, shape index: {}]   ;;  %s6080_s17 = inlined_call_operand.hbm [shape: f32[2,8,32], index: 17, kind: output, shape index: {}]  }
   0x1   :  { %6107 = sst [smem:[#allocation27_spill]] %s6063_s0 }
   0x2   :  { %6108 = sst [smem:[#allocation28_spill]] %s6064_s1 }
   0x3   :  { %s6109_s26 = sld [smem:[#allocation28_spill]]  ;;  %v6083_v2 = vmov 0.0   ;;  %vm165_vm0 = vcmask 261120   ;;  %vm5000_vm1 = vmmov 0  }
   0x4   :  { %4488 = vmatprep.subr.mxu0 %v6083_v2  ;;  %4499 = vmatprep.subr.mxu1 %v6083_v2  ;;  %s6110_s29 = sld [smem:[#allocation27_spill]] }
   0x5   :  { %4496 = vmatprep.mubr.msk.f32.mxu0 %vm5000_vm1, %v6083_v2  ;;  %4507 = vmatprep.mubr.msk.f32.mxu1 %vm5000_vm1, %v6083_v2 }
   0x9   :  { %v5097_v0 = vld [vmem:[%s6109_s26 + $0x18] sm:$0xff]  ;;  %v5109_v3 = vld [vmem:[%s6109_s26 + $0x10] sm:$0xff]  ;;  %v5123_v5 = vld [vmem:[%s6109_s26 + $0x8] sm:$0xff] }
   0xa   :  { %v5102_v1 = vld [vmem:[%s6109_s26 + $0x38] sm:$0xff]  ;;  %v5114_v4 = vld [vmem:[%s6109_s26 + $0x30] sm:$0xff]  ;;  %4489 = vmatpush3.msra.mxu0 %v5097_v0  ;;  %v5128_v6 = vld [vmem:[%s6109_s26 + $0x28] sm:$0xff] }
   0xb   :  { %4500 = vmatpush3.msra.mxu1 %v5102_v1  ;;  %4490 = vmatprep.subr.mxu0 %v6083_v2  ;;  %v5137_v7 = vld [vmem:[%s6109_s26] sm:$0xff]  ;;  %v5162_v10 = vld [vmem:[%s6109_s26 + $0x58] sm:$0xff]  ;;  %v5178_v12 = vld [vmem:[%s6109_s26 + $0x50] sm:$0xff] }
   0xc   :  { %4501 = vmatprep.subr.mxu1 %v6083_v2  ;;  %4491 = vmatpush3.msra.mxu0 %v5109_v3  ;;  %v5144_v8 = vld [vmem:[%s6109_s26 + $0x20] sm:$0xff]  ;;  %v5167_v11 = vld [vmem:[%s6109_s26 + $0x78] sm:$0xff]  ;;  %v5183_v13 = vld [vmem:[%s6109_s26 + $0x70] sm:$0xff] }
   0xd   :  { %4502 = vmatpush3.msra.mxu1 %v5114_v4  ;;  %4492 = vmatprep.subr.mxu0 %v6083_v2  ;;  %v5149_v9 = vld [vmem:[%s6110_s29] sm:$0xff] }
   0xe   :  { %4503 = vmatprep.subr.mxu1 %v6083_v2  ;;  %4493 = vmatpush3.msra.mxu0 %v5123_v5 }
   0xf   :  { %4504 = vmatpush3.msra.mxu1 %v5128_v6  ;;  %4494 = vmatprep.subr.mxu0 %v6083_v2 }
  0x10   :  { %4505 = vmatprep.subr.mxu1 %v6083_v2  ;;  %4495 = vmatpush3.msra.mxu0 %v5137_v7 }
  0x11   :  { %4506 = vmatpush3.msra.mxu1 %v5144_v8  ;;  %4497 = vmatmul.mubr.msk.f32.vlgmr.msra.gmra.mxu0 %vm165_vm0, %v5149_v9 }
  0x12   :  { %4510 = vmatprep.subr.mxu0 %v6083_v2  ;;  %4521 = vmatprep.subr.mxu1 %v6083_v2 }
  0x13   :  { %4508 = vmatmul.mubr.msk.f32.vlgmr.msra.gmra.mxu1 %vm165_vm0, %v5149_v9 }
  0x14   :  { %22 = vsyncpa [#allocation3], 0  ;;  %4511 = vmatpush3.msra.mxu0 %v5162_v10  ;;  %4522 = vmatpush3.msra.mxu1 %v5167_v11  ;;  %v5192_v14 = vld [vmem:[%s6109_s26 + $0x48] sm:$0xff]  ;;  %v5206_v16 = vld [vmem:[%s6109_s26 + $0x40] sm:$0xff]  ;;  %vm1061_vm2 = vcmask 64512   ;;  %vm2123_vm3 = vcmask 523264  }
  0x15   :  { %4512 = vmatprep.subr.mxu0 %v6083_v2  ;;  %4523 = vmatprep.subr.mxu1 %v6083_v2  ;;  %v5197_v15 = vld [vmem:[%s6109_s26 + $0x68] sm:$0xff]  ;;  %v5213_v17 = vld [vmem:[%s6109_s26 + $0x60] sm:$0xff]  ;;  %v5226_v18 = vld [vmem:[%s6066_s3 + $0x18] sm:$0xff] }
  0x16   :  { %4513 = vmatpush3.msra.mxu0 %v5178_v12  ;;  %4524 = vmatpush3.msra.mxu1 %v5183_v13  ;;  %v5231_v19 = vld [vmem:[%s6066_s3 + $0x38] sm:$0xff]  ;;  %v5242_v20 = vld [vmem:[%s6066_s3 + $0x10] sm:$0xff]  ;;  %v5256_v22 = vld [vmem:[%s6066_s3 + $0x8] sm:$0xff] }
  0x17   :  { %4514 = vmatprep.subr.mxu0 %v6083_v2  ;;  %4525 = vmatprep.subr.mxu1 %v6083_v2  ;;  %v5247_v21 = vld [vmem:[%s6066_s3 + $0x30] sm:$0xff]  ;;  %v5261_v23 = vld [vmem:[%s6066_s3 + $0x28] sm:$0xff]  ;;  %v5270_v24 = vld [vmem:[%s6066_s3] sm:$0xff] }
  0x18   :  { %4515 = vmatpush3.msra.mxu0 %v5192_v14  ;;  %4526 = vmatpush3.msra.mxu1 %v5197_v15  ;;  %v5277_v25 = vld [vmem:[%s6066_s3 + $0x20] sm:$0xff]  ;;  %v5290_v26 = vld [vmem:[%s6066_s3 + $0x58] sm:$0xff]  ;;  %v5306_v28 = vld [vmem:[%s6066_s3 + $0x50] sm:$0xff] }
  0x19   :  { %4516 = vmatprep.subr.mxu0 %v6083_v2  ;;  %4527 = vmatprep.subr.mxu1 %v6083_v2  ;;  %v5295_v27 = vld [vmem:[%s6066_s3 + $0x78] sm:$0xff]  ;;  %v5311_v29 = vld [vmem:[%s6066_s3 + $0x70] sm:$0xff]  ;;  %v5320_v30 = vld [vmem:[%s6066_s3 + $0x48] sm:$0xff] }
  0x1a   :  { %4517 = vmatpush3.msra.mxu0 %v5206_v16  ;;  %4518 = vmatprep.mubr.msk.f32.mxu0 %vm5000_vm1, %v6083_v2  ;;  %v5325_v31 = vld [vmem:[%s6066_s3 + $0x68] sm:$0xff]  ;;  %v5334_v32 = vld [vmem:[%s6066_s3 + $0x40] sm:$0xff]  ;;  %v5364_v34 = vld [vmem:[%s6068_s5 + $0x18] sm:$0xff] }
  0x1b   :  { %4528 = vmatpush3.msra.mxu1 %v5213_v17  ;;  %4519 = vmatmul.mubr.msk.f32.vlgmr.msra.gmra.mxu0 %vm165_vm0, %v5149_v9  ;;  %v5341_v33 = vld [vmem:[%s6066_s3 + $0x60] sm:$0xff]  ;;  %v5371_v35 = vld [vmem:[%s6068_s5 + $0x10] sm:$0xff]  ;;  %v5376_v36 = vld [vmem:[%s6068_s5 + $0x8] sm:$0xff] }
  0x1c   :  { %4529 = vmatprep.mubr.msk.f32.mxu1 %vm5000_vm1, %v6083_v2  ;;  %4532 = vmatprep.subr.mxu0 %v6083_v2  ;;  %6111 = vst [vmem:[#allocation5_spill] sm:$0xff] %v5371_v35  ;;  %6112 = vst [vmem:[#allocation6_spill] sm:$0xff] %v5376_v36  ;;  %v5383_v37 = vld [vmem:[%s6068_s5] sm:$0xff]  ;;  %v5396_v38 = vld [vmem:[%s6068_s5 + $0x58] sm:$0xff] }
  0x1d   :  { %4543 = vmatprep.subr.mxu1 %v6083_v2  ;;  %4530 = vmatmul.mubr.msk.f32.vlgmr.msra.gmra.mxu1 %vm165_vm0, %v5149_v9  ;;  %6113 = vst [vmem:[#allocation7_spill] sm:$0xff] %v5383_v37  ;;  %6114 = vst [vmem:[#allocation8_spill] sm:$0xff] %v5396_v38  ;;  %v5403_v39 = vld [vmem:[%s6068_s5 + $0x38] sm:$0xff]  ;;  %v5408_v40 = vld [vmem:[%s6068_s5 + $0x50] sm:$0xff] }
  0x1e   :  { %4533 = vmatpush3.msra.mxu0 %v5226_v18  ;;  %4544 = vmatpush3.msra.mxu1 %v5231_v19  ;;  %6115 = vst [vmem:[#allocation9_spill] sm:$0xff] %v5408_v40  ;;  %v5413_v41 = vld [vmem:[%s6068_s5 + $0x30] sm:$0xff]  ;;  %v5420_v42 = vld [vmem:[%s6068_s5 + $0x48] sm:$0xff]  ;;  %v5432_v44 = vld [vmem:[%s6068_s5 + $0x40] sm:$0xff] }
  0x1f   :  { %4534 = vmatprep.subr.mxu0 %v6083_v2  ;;  %4545 = vmatprep.subr.mxu1 %v6083_v2  ;;  %6116 = vst [vmem:[#allocation10_spill] sm:$0xff] %v5420_v42  ;;  %v5427_v43 = vld [vmem:[%s6068_s5 + $0x28] sm:$0xff]  ;;  %6117 = vst [vmem:[#allocation11_spill] sm:$0xff] %v5432_v44  ;;  %v5446_v45 = vld [vmem:[%s6068_s5 + $0x20] sm:$0xff] }
  0x20   :  { %4535 = vmatpush3.msra.mxu0 %v5242_v20  ;;  %4546 = vmatpush3.msra.mxu1 %v5247_v21  ;;  %v5456_v46 = vld [vmem:[%s6068_s5 + $0x78] sm:$0xff]  ;;  %v5462_v47 = vld [vmem:[%s6068_s5 + $0x70] sm:$0xff]  ;;  %v5473_v48 = vld [vmem:[%s6068_s5 + $0x68] sm:$0xff] }
  0x21   :  { %4536 = vmatprep.subr.mxu0 %v6083_v2  ;;  %4547 = vmatprep.subr.mxu1 %v6083_v2  ;;  %v5481_v49 = vld [vmem:[%s6068_s5 + $0x60] sm:$0xff] }
  0x22   :  { %4537 = vmatpush3.msra.mxu0 %v5256_v22  ;;  %4548 = vmatpush3.msra.mxu1 %v5261_v23  ;;  %v5492_v58 = vld [vmem:[%s6065_s2] ss:$0 sm:$0xff]  ;;  %v5503_v62 = vld [vmem:[%s6067_s4 + $0x1] ss:$0 sm:$0xff] }
  0x23   :  { %4538 = vmatprep.subr.mxu0 %v6083_v2  ;;  %4549 = vmatprep.subr.mxu1 %v6083_v2  ;;  %6118 = vst [vmem:[#allocation12_spill] sm:$0xff] %v5492_v58  ;;  %v5497_v59 = vld [vmem:[%s6067_s4] ss:$0 sm:$0xff]  ;;  %6120 = vst [vmem:[#allocation14_spill] sm:$0xff] %v5503_v62  ;;  %v5508_v63 = vld [vmem:[%s6065_s2 + $0x1] ss:$0 sm:$0xff] }
  0x24   :  { %4539 = vmatpush3.msra.mxu0 %v5270_v24  ;;  %4540 = vmatprep.mubr.msk.f32.mxu0 %vm5000_vm1, %v6083_v2  ;;  %6119 = vst [vmem:[#allocation13_spill] sm:$0xff] %v5497_v59  ;;  %6121 = vst [vmem:[#allocation15_spill] sm:$0xff] %v5508_v63 }
  0x25   :  { %4550 = vmatpush3.msra.mxu1 %v5277_v25  ;;  %4541 = vmatmul.mubr.msk.f32.vlgmr.msra.gmra.mxu0 %vm165_vm0, %v5149_v9 }
  0x26   :  { %4551 = vmatprep.mubr.msk.f32.mxu1 %vm5000_vm1, %v6083_v2  ;;  %4554 = vmatprep.subr.mxu0 %v6083_v2 }
  0x27   :  { %4565 = vmatprep.subr.mxu1 %v6083_v2  ;;  %4552 = vmatmul.mubr.msk.f32.vlgmr.msra.gmra.mxu1 %vm165_vm0, %v5149_v9 }
  0x28   :  { %4555 = vmatpush3.msra.mxu0 %v5290_v26  ;;  %4566 = vmatpush3.msra.mxu1 %v5295_v27 }
  0x29   :  { %4556 = vmatprep.subr.mxu0 %v6083_v2  ;;  %4567 = vmatprep.subr.mxu1 %v6083_v2 }
  0x2a   :  { %4557 = vmatpush3.msra.mxu0 %v5306_v28  ;;  %4568 = vmatpush3.msra.mxu1 %v5311_v29 }
  0x2b   :  { %4558 = vmatprep.subr.mxu0 %v6083_v2  ;;  %4569 = vmatprep.subr.mxu1 %v6083_v2 }
  0x2c   :  { %4559 = vmatpush3.msra.mxu0 %v5320_v30  ;;  %4570 = vmatpush3.msra.mxu1 %v5325_v31 }
  0x2d   :  { %4560 = vmatprep.subr.mxu0 %v6083_v2  ;;  %4571 = vmatprep.subr.mxu1 %v6083_v2 }
  0x2e   :  { %4561 = vmatpush3.msra.mxu0 %v5334_v32  ;;  %4562 = vmatprep.mubr.msk.f32.mxu0 %vm5000_vm1, %v6083_v2 }
  0x2f   :  { %4572 = vmatpush3.msra.mxu1 %v5341_v33  ;;  %4573 = vmatprep.mubr.msk.f32.mxu1 %vm5000_vm1, %v6083_v2 }
  0x30   :  { %4563 = vmatmul.mubr.msk.f32.vlgmr.msra.gmra.mxu0 %vm165_vm0, %v5149_v9  ;;  %4574 = vmatmul.mubr.msk.f32.vlgmr.msra.gmra.mxu1 %vm165_vm0, %v5149_v9 }
  0x31   :  { %4576 = vmatprep.subr.mxu0 %v6083_v2  ;;  %4584 = vmatprep.mubr.msk.f32.mxu0 %vm5000_vm1, %v6083_v2 }
  0x32   :  { %4587 = vmatprep.subr.mxu1 %v6083_v2  ;;  %4595 = vmatprep.mubr.msk.f32.mxu1 %vm5000_vm1, %v6083_v2 }
  0x33   :  { %4577 = vmatpush3.msra.mxu0 %v5364_v34  ;;  %4588 = vmatpush3.msra.mxu1 %v5403_v39 }
  0x34   :  { %4578 = vmatprep.subr.mxu0 %v6083_v2  ;;  %4589 = vmatprep.subr.mxu1 %v6083_v2 }
  0x35   :  { %4579 = vmatpush3.msra.mxu0 %v5371_v35  ;;  %4590 = vmatpush3.msra.mxu1 %v5413_v41 }
  0x36   :  { %4580 = vmatprep.subr.mxu0 %v6083_v2  ;;  %4591 = vmatprep.subr.mxu1 %v6083_v2 }
  0x37   :  { %4581 = vmatpush3.msra.mxu0 %v5376_v36  ;;  %4592 = vmatpush3.msra.mxu1 %v5427_v43 }
  0x38   :  { %4582 = vmatprep.subr.mxu0 %v6083_v2  ;;  %4593 = vmatprep.subr.mxu1 %v6083_v2 }
  0x39   :  { %4583 = vmatpush3.msra.mxu0 %v5383_v37  ;;  %4594 = vmatpush3.msra.mxu1 %v5446_v45 }
  0x3a   :  { %4598 = vmatprep.subr.mxu0 %v6083_v2  ;;  %4585 = vmatmul.mubr.msk.f32.vlgmr.msra.gmra.mxu0 %vm165_vm0, %v5149_v9 }
  0x3b   :  { %4606 = vmatprep.mubr.msk.f32.mxu0 %vm5000_vm1, %v6083_v2  ;;  %4599 = vmatpush3.msra.mxu0 %v5396_v38 }
  0x3c   :  { %4600 = vmatprep.subr.mxu0 %v6083_v2  ;;  %4609 = vmatprep.subr.mxu1 %v6083_v2 }
  0x3d   :  { %4601 = vmatpush3.msra.mxu0 %v5408_v40  ;;  %4596 = vmatmul.mubr.msk.f32.vlgmr.msra.gmra.mxu1 %vm165_vm0, %v5149_v9 }
  0x3e   :  { %4602 = vmatprep.subr.mxu0 %v6083_v2  ;;  %4610 = vmatpush3.msra.mxu1 %v5456_v46 }
  0x3f   :  { %4603 = vmatpush3.msra.mxu0 %v5420_v42  ;;  %4611 = vmatprep.subr.mxu1 %v6083_v2 }
  0x40   :  { %4604 = vmatprep.subr.mxu0 %v6083_v2  ;;  %4617 = vmatprep.mubr.msk.f32.mxu1 %vm5000_vm1, %v6083_v2 }
  0x41   :  { %4605 = vmatpush3.msra.mxu0 %v5432_v44  ;;  %4612 = vmatpush3.msra.mxu1 %v5462_v47  ;;  %v6122_v44 = vmov 0.0  }
  0x42   :  { %4607 = vmatmul.mubr.msk.f32.vlgmr.msra.gmra.mxu0 %vm165_vm0, %v5149_v9  ;;  %4620 = vmatprep.subr.mxu0 %v6083_v2 }
  0x43   :  { %4622 = vmatprep.mubr.msk.f32.mxu0 %vm5000_vm1, %v6083_v2  ;;  %4613 = vmatprep.subr.mxu1 %v6083_v2 }
  0x44   :  { %4614 = vmatpush3.msra.mxu1 %v5473_v48 }
  0x45   :  { %4615 = vmatprep.subr.mxu1 %v6083_v2 }
  0x46   :  { %4616 = vmatpush3.msra.mxu1 %v5481_v49 }
  0x47   :  { %4618 = vmatmul.mubr.msk.f32.vlgmr.msra.gmra.mxu1 %vm165_vm0, %v5149_v9  ;;  %4635 = vmatprep.subr.mxu1 %v6083_v2 }
  0x48   :  { %4637 = vmatprep.mubr.msk.f32.mxu1 %vm5000_vm1, %v6083_v2 }
  0xd1   :  { %v235_v50 = vpop.f32.mrf.mxu0 }
  0xd2   :  { %v236_v60 = vadd.f32 %v5492_v58, %v235_v50 }
  0xd3   :  { %v4498_v51 = vpop.f32.mrf.mxu0  ;;  %v305_v52 = vpop.f32.mrf.mxu1 }
  0xd4   :  { %v1057_v50 = vmul.f32 0.35355338, %v236_v60  ;;  %v306_v2 = vadd.f32 %v5508_v63, %v305_v52  ;;  %v5527_v52 = vld [vmem:[%s6065_s2 + $0x3] ss:$0 sm:$0xff] }
  0xd5   :  { %v4509_v53 = vpop.f32.mrf.mxu1  ;;  %6124 = vst [vmem:[#allocation17_spill] sm:$0xff] %v5527_v52 }
  0xdb   :  { %v375_v54 = vpop.f32.mrf.mxu0 }
  0xdd   :  { %v4520_v55 = vpop.f32.mrf.mxu0  ;;  %v445_v56 = vpop.f32.mrf.mxu1 }
  0xdf   :  { %v4531_v57 = vpop.f32.mrf.mxu1 }
  0xe5   :  { %v539_v61 = vpop.f32.mrf.mxu0 }
  0xe6   :  { %v540_v51 = vadd.f32 %v5497_v59, %v539_v61  ;;  %v1058_v61 = vmul.f32 0.35355338, %v306_v2  ;;  %v5538_v2 = vld [vmem:[%s6067_s4 + $0x3] ss:$0 sm:$0xff] }
  0xe7   :  { %v4542_v53 = vpop.f32.mrf.mxu0  ;;  %v609_v55 = vpop.f32.mrf.mxu1  ;;  %6126 = vst [vmem:[#allocation19_spill] sm:$0xff] %v5538_v2 }
  0xe8   :  { %v610_v57 = vadd.f32 %v5503_v62, %v609_v55  ;;  %4621 = vmatpush3.xpose.msk.msra.mxu0 %vm1061_vm2, %v540_v51  ;;  %v5522_v53 = vld [vmem:[%s6065_s2 + $0x2] ss:$0 sm:$0xff]  ;;  %v446_v51 = vadd.f32 %v5527_v52, %v445_v56 }
  0xe9   :  { %v4553_v58 = vpop.f32.mrf.mxu1  ;;  %4625 = vmatprep.subr.mxu0 %v6122_v44  ;;  %6123 = vst [vmem:[#allocation16_spill] sm:$0xff] %v5522_v53  ;;  %v376_v60 = vadd.f32 %v5522_v53, %v375_v54  ;;  %v5560_v54 = vld [vmem:[%s6069_s6] ss:$0 sm:$0xff] }
  0xea   :  { %v5533_v58 = vld [vmem:[%s6067_s4 + $0x2] ss:$0 sm:$0xff]  ;;  %v1060_v42 = vmul.f32 0.35355338, %v446_v51  ;;  %6127 = vst [vmem:[#allocation20_spill] sm:$0xff] %v5560_v54 }
  0xeb   :  { %4623 = vmatmul.mubr.msk.f32.vlgmr.msra.gmra.mxu0 %vm1061_vm2, %v1057_v50  ;;  %6125 = vst [vmem:[#allocation18_spill] sm:$0xff] %v5533_v58 }
  0xec   :  { %4626 = vmatpush3.xpose.msk.msra.mxu0 %vm1061_vm2, %v610_v57  ;;  %4627 = vmatprep.mubr.msk.f32.mxu0 %vm5000_vm1, %v6122_v44 }
  0xed   :  { %4630 = vmatprep.subr.mxu0 %v6122_v44 }
  0xef   :  { %4628 = vmatmul.mubr.msk.f32.vlgmr.msra.gmra.mxu0 %vm1061_vm2, %v1058_v61  ;;  %v1059_v61 = vmul.f32 0.35355338, %v376_v60 }
  0xf0   :  { %v679_v55 = vpop.f32.mrf.mxu0  ;;  %v749_v57 = vpop.f32.mrf.mxu1  ;;  %4632 = vmatprep.mubr.msk.f32.mxu0 %vm5000_vm1, %v6122_v44 }
  0xf1   :  { %v680_v50 = vadd.f32 %v5533_v58, %v679_v55  ;;  %v750_v63 = vadd.f32 %v5538_v2, %v749_v57 }
  0xf2   :  { %v4564_v62 = vpop.f32.mrf.mxu0  ;;  %v4575_v59 = vpop.f32.mrf.mxu1 }
  0xf3   :  { %4631 = vmatpush3.xpose.msk.msra.mxu0 %vm1061_vm2, %v680_v50  ;;  %4636 = vmatpush3.xpose.msk.msra.mxu1 %vm1061_vm2, %v750_v63 }
  0xf4   :  { %4640 = vmatprep.subr.mxu0 %v6122_v44  ;;  %4645 = vmatprep.subr.mxu1 %v6122_v44 }
  0xf6   :  { %4633 = vmatmul.mubr.msk.f32.vlgmr.msra.gmra.mxu0 %vm1061_vm2, %v1059_v61  ;;  %4638 = vmatmul.mubr.msk.f32.vlgmr.msra.gmra.mxu1 %vm1061_vm2, %v1060_v42  ;;  %v5569_v42 = vld [vmem:[%s6069_s6 + $0x1] ss:$0 sm:$0xff] }
  0xf7   :  { %4642 = vmatprep.mubr.msk.f32.mxu0 %vm5000_vm1, %v6122_v44  ;;  %4647 = vmatprep.mubr.msk.f32.mxu1 %vm5000_vm1, %v6122_v44  ;;  %6128 = vst [vmem:[#allocation21_spill] sm:$0xff] %v5569_v42 }
  0xfa   :  { %v843_v56 = vpop.f32.mrf.mxu0 }
  0xfb   :  { %v844_v59 = vadd.f32 %v5560_v54, %v843_v56 }
  0xfc   :  { %v4586_v62 = vpop.f32.mrf.mxu0 }
  0xfd   :  { %4641 = vmatpush3.msra.mxu0 %v844_v59  ;;  %v913_v51 = vpop.f32.mrf.mxu1 }
  0xfe   :  { %4650 = vmatprep.subr.mxu0 %v6122_v44  ;;  %v914_v55 = vadd.f32 %v5569_v42, %v913_v51 }
  0xff   :  { %v4597_v57 = vpop.f32.mrf.mxu1 }
 0x100   :  { %4646 = vmatpush3.msra.mxu1 %v914_v55 }
 0x101   :  { %4655 = vmatprep.subr.mxu1 %v6122_v44 }
 0x102   :  { %v5564_v63 = vpop.f32.mrf.mxu0 }
 0x104   :  { %v4608_v60 = vpop.f32.mrf.mxu0 }
 0x107   :  { %v5573_v50 = vpop.f32.mrf.mxu1 }
 0x109   :  { %v4619_v61 = vpop.f32.mrf.mxu1 }
 0x1ab   :  { %v1134_v56 = vpop.f32.mrf.mxu0 }
 0x1ac   :  { %v1366_v59 = vsel %vm1061_vm2, %v1134_v56, -inf }
 0x1ad   :  { %1367 = vmax.xlane.f32.xlu0 %v1366_v59  ;;  %v4624_v62 = vpop.f32.mrf.mxu0 }
 0x1af   :  { %v1210_v54 = vpop.f32.mrf.mxu0 }
 0x1b0   :  { %v1369_v58 = vsel %vm1061_vm2, %v1210_v54, -inf }
 0x1b1   :  { %1370 = vmax.xlane.f32.xlu0 %v1369_v58  ;;  %v4629_v60 = vpop.f32.mrf.mxu0 }
 0x1b6   :  { %v1286_v52 = vpop.f32.mrf.mxu0  ;;  %v1362_v53 = vpop.f32.mrf.mxu1 }
 0x1b7   :  { %v1372_v51 = vsel %vm1061_vm2, %v1286_v52, -inf  ;;  %v1375_v42 = vsel %vm1061_vm2, %v1362_v53, -inf }
 0x1b8   :  { %v4639_v55 = vpop.f32.mrf.mxu1  ;;  %1373 = vmax.xlane.f32.xlu1 %v1372_v51  ;;  %v4634_v57 = vpop.f32.mrf.mxu0 }
 0x1bc   :  { %1376 = vmax.xlane.f32.xlu1 %v1375_v42 }
 0x236   :  { %v1368_v61 = vpop.xlane.xlu0 %1367 }
 0x237   :  { %v1378_v2 = vsub.f32 %v1134_v56, %v1368_v61 }
 0x239   :  { %v1382_v40 = vmul.f32 1.442695, %v1378_v2 }
 0x23a   :  { %v1371_v59 = vpop.xlane.xlu0 %1370 }
 0x23b   :  { %4937 = vpow2.f32 %v1382_v40  ;;  %v1379_v62 = vsub.f32 %v1210_v54, %v1371_v59 }
 0x23d   :  { %v1384_v38 = vmul.f32 1.442695, %v1379_v62 }
 0x23f   :  { %4939 = vpow2.f32 %v1384_v38 }
 0x241   :  { %v1374_v58 = vpop.xlane.xlu1 %1373 }
 0x242   :  { %v1380_v60 = vsub.f32 %v1286_v52, %v1374_v58  ;;  %v5593_v58 = vld [vmem:[%s6069_s6 + $0x3] ss:$0 sm:$0xff] }
 0x244   :  { %v1386_v37 = vmul.f32 1.442695, %v1380_v60 }
 0x245   :  { %v1377_v36 = vpop.xlane.xlu1 %1376 }
 0x246   :  { %4941 = vpow2.f32 %v1386_v37  ;;  %v1381_v35 = vsub.f32 %v1362_v53, %v1377_v36  ;;  %v5586_v53 = vld [vmem:[%s6069_s6 + $0x2] ss:$0 sm:$0xff] }
 0x247   :  { %v984_v62 = vadd.f32 %v5586_v53, %v5564_v63 }
 0x248   :  { %v4938_v55 = vpop.eup %4937  ;;  %v1388_v51 = vmul.f32 1.442695, %v1381_v35 }
 0x249   :  { %v1390_v57 = vsel %vm1061_vm2, %v4938_v55, 0.0 }
 0x24a   :  { %4943 = vpow2.f32 %v1388_v51  ;;  %1391 = vadd.xlane.f32.xlu0 %v1390_v57 }
 0x24c   :  { %v4940_v42 = vpop.eup %4939 }
 0x24d   :  { %v1393_v2 = vsel %vm1061_vm2, %v4940_v42, 0.0 }
 0x24e   :  { %1394 = vadd.xlane.f32.xlu1 %v1393_v2 }
 0x253   :  { %v4942_v40 = vpop.eup %4941 }
 0x254   :  { %v1396_v54 = vsel %vm1061_vm2, %v4942_v40, 0.0 }
 0x255   :  { %1397 = vadd.xlane.f32.xlu0 %v1396_v54  ;;  %v5628_v54 = vld [vmem:[%s6070_s7 + $0x10] sm:$0xff] }
 0x257   :  { %v4944_v38 = vpop.eup %4943 }
 0x258   :  { %v1399_v52 = vsel %vm1061_vm2, %v4944_v38, 0.0 }
 0x259   :  { %1400 = vadd.xlane.f32.xlu1 %v1399_v52 }
 0x2d3   :  { %v1392_v37 = vpop.xlane.xlu0 %1391 }
 0x2d4   :  { %4945 = vrcp.f32 %v1392_v37  ;;  %v5637_v37 = vld [vmem:[%s6070_s7 + $0x18] sm:$0xff] }
 0x2d7   :  { %v1395_v36 = vpop.xlane.xlu1 %1394 }
 0x2d8   :  { %4947 = vrcp.f32 %v1395_v36 }
 0x2de   :  { %v1398_v35 = vpop.xlane.xlu0 %1397 }
 0x2df   :  { %4949 = vrcp.f32 %v1398_v35 }
 0x2e1   :  { %v4946_v56 = vpop.eup %4945 }
 0x2e2   :  { %v1401_v61 = vpop.xlane.xlu1 %1400  ;;  %v1406_v59 = vmul.f32 %v4946_v56, %v4938_v55  ;;  %v1054_v55 = vadd.f32 %v5593_v58, %v5573_v50  ;;  %v5614_v50 = vld [vmem:[%s6070_s7] sm:$0xff] }
 0x2e3   :  { %4951 = vrcp.f32 %v1401_v61 }
 0x2e4   :  { %4643 = vmatmul.mubr.msk.f32.vlgmr.msra.gmra.mxu0 %vm1061_vm2, %v1406_v59 }
 0x2e5   :  { %v4948_v60 = vpop.eup %4947  ;;  %4651 = vmatpush3.msra.mxu0 %v984_v62  ;;  %4652 = vmatprep.mubr.msk.f32.mxu0 %vm5000_vm1, %v6122_v44 }
 0x2e6   :  { %v1407_v51 = vmul.f32 %v4948_v60, %v4940_v42  ;;  %4660 = vmatprep.subr.mxu0 %v6122_v44 }
 0x2e8   :  { %4648 = vmatmul.mubr.msk.f32.vlgmr.msra.gmra.mxu1 %vm1061_vm2, %v1407_v51 }
 0x2e9   :  { %4656 = vmatpush3.msra.mxu1 %v1054_v55  ;;  %4657 = vmatprep.mubr.msk.f32.mxu1 %vm5000_vm1, %v6122_v44 }
 0x2ea   :  { %4665 = vmatprep.subr.mxu1 %v6122_v44 }
 0x2ec   :  { %v4950_v63 = vpop.eup %4949 }
 0x2ed   :  { %v1408_v57 = vmul.f32 %v4950_v63, %v4942_v40  ;;  %v5621_v40 = vld [vmem:[%s6070_s7 + $0x8] sm:$0xff] }
 0x2ef   :  { %4653 = vmatmul.mubr.msk.f32.vlgmr.msra.gmra.mxu0 %vm1061_vm2, %v1408_v57 }
 0x2f0   :  { %v4952_v2 = vpop.eup %4951  ;;  %4662 = vmatprep.mubr.msk.f32.mxu0 %vm5000_vm1, %v6122_v44  ;;  %4661 = vmatpush3.msra.mxu0 %v5614_v50 }
 0x2f1   :  { %v1409_v42 = vmul.f32 %v4952_v2, %v4944_v38  ;;  %4670 = vmatprep.subr.mxu0 %v6122_v44 }
 0x2f3   :  { %4658 = vmatmul.mubr.msk.f32.vlgmr.msra.gmra.mxu1 %vm1061_vm2, %v1409_v42 }
 0x2f4   :  { %4667 = vmatprep.mubr.msk.f32.mxu1 %vm5000_vm1, %v6122_v44  ;;  %4666 = vmatpush3.msra.mxu1 %v5621_v40 }
 0x2f5   :  { %4675 = vmatprep.subr.mxu1 %v6122_v44 }
 0x3a4   :  { %v1479_v38 = vpop.f32.mrf.mxu0 }
 0x3a5   :  { %4663 = vmatmul.mubr.msk.f32.vlgmr.msra.gmra.mxu0 %vm1061_vm2, %v1479_v38 }
 0x3a6   :  { %v4644_v52 = vpop.f32.mrf.mxu0  ;;  %4671 = vmatpush3.msra.mxu0 %v5628_v54  ;;  %4672 = vmatprep.mubr.msk.f32.mxu0 %vm5000_vm1, %v6122_v44 }
 0x3a7   :  { %4680 = vmatprep.subr.mxu0 %v6122_v44 }
 0x3a8   :  { %v1552_v36 = vpop.f32.mrf.mxu1 }
 0x3a9   :  { %4668 = vmatmul.mubr.msk.f32.vlgmr.msra.gmra.mxu1 %vm1061_vm2, %v1552_v36 }
 0x3aa   :  { %v4649_v35 = vpop.f32.mrf.mxu1  ;;  %4676 = vmatpush3.msra.mxu1 %v5637_v37  ;;  %4677 = vmatprep.mubr.msk.f32.mxu1 %vm5000_vm1, %v6122_v44 }
 0x3ab   :  { %4691 = vmatprep.subr.mxu1 %v6122_v44 }
 0x3af   :  { %v1625_v56 = vpop.f32.mrf.mxu0 }
 0x3b0   :  { %4673 = vmatmul.mubr.msk.f32.vlgmr.msra.gmra.mxu0 %vm1061_vm2, %v1625_v56 }
 0x3b1   :  { %v4654_v61 = vpop.f32.mrf.mxu0  ;;  %4688 = vmatprep.mubr.msk.f32.mxu0 %vm5000_vm1, %v6122_v44 }
 0x3b2   :  { %v5657_v61 = vld [vmem:[%s6071_s8] ss:$0 sm:$0xff] }
 0x3b3   :  { %v1698_v59 = vpop.f32.mrf.mxu1  ;;  %6129 = vst [vmem:[#allocation22_spill] sm:$0xff] %v5657_v61 }
 0x3b4   :  { %4678 = vmatmul.mubr.msk.f32.vlgmr.msra.gmra.mxu1 %vm1061_vm2, %v1698_v59 }
 0x3b5   :  { %v4659_v62 = vpop.f32.mrf.mxu1  ;;  %4707 = vmatprep.mubr.msk.f32.mxu1 %vm5000_vm1, %v6122_v44 }
 0x465   :  { %v1771_v60 = vpop.f32.mrf.mxu0 }
 0x466   :  { %v1994_v42 = vsel %vm165_vm0, %v1771_v60, 0.0 }
 0x467   :  { %v4664_v51 = vpop.f32.mrf.mxu0 }
 0x469   :  { %v1844_v55 = vpop.f32.mrf.mxu1 }
 0x46a   :  { %v1995_v57 = vsel %vm165_vm0, %v1844_v55, 0.0 }
 0x46b   :  { %v4669_v63 = vpop.f32.mrf.mxu1  ;;  %v1996_v52 = vadd.f32 %v1995_v57, %v1994_v42 }
 0x470   :  { %v1917_v2 = vpop.f32.mrf.mxu0 }
 0x471   :  { %v1997_v38 = vsel %vm165_vm0, %v1917_v2, 0.0 }
 0x472   :  { %v4674_v36 = vpop.f32.mrf.mxu0  ;;  %v1998_v35 = vadd.f32 %v1997_v38, %v1996_v52 }
 0x473   :  { %v5667_v36 = vld [vmem:[%s6072_s9 + $0x18] sm:$0xff] }
 0x474   :  { %v1990_v56 = vpop.f32.mrf.mxu1  ;;  %4681 = vmatpush3.msra.mxu0 %v5667_v36 }
 0x475   :  { %v1999_v59 = vsel %vm165_vm0, %v1990_v56, 0.0  ;;  %4682 = vmatprep.subr.mxu0 %v6122_v44  ;;  %v5686_v56 = vld [vmem:[%s6072_s9] sm:$0xff] }
 0x476   :  { %v2000_v62 = vadd.f32 %v1999_v59, %v1998_v35  ;;  %v4679_v51 = vpop.f32.mrf.mxu1  ;;  %v5679_v35 = vld [vmem:[%s6072_s9 + $0x8] sm:$0xff]  ;;  %6130 = vst [vmem:[#allocation23_spill] sm:$0xff] %v5686_v56  ;;  %v5695_v59 = vld [vmem:[%s6074_s11 + $0x38] sm:$0xff] }
 0x477   :  { %4692 = vmatpush3.msra.mxu1 %v5695_v59  ;;  %v5709_v51 = vld [vmem:[%s6074_s11 + $0x28] sm:$0xff] }
 0x478   :  { %v2007_v55 = vadd.f32 %v5657_v61, %v2000_v62  ;;  %4693 = vmatprep.subr.mxu1 %v6122_v44  ;;  %v5702_v62 = vld [vmem:[%s6074_s11 + $0x30] sm:$0xff]  ;;  %v5737_v61 = vld [vmem:[%s6076_s13] ss:$0 sm:$0xff] }
 0x479   :  { %4694 = vmatpush3.msra.mxu1 %v5702_v62 }
 0x47a   :  { %v2008_v63 = vadd.f32 %v2007_v55, %v5149_v9  ;;  %v5674_v9 = vld [vmem:[%s6072_s9 + $0x10] sm:$0xff]  ;;  %4695 = vmatprep.subr.mxu1 %v6122_v44  ;;  %v5716_v55 = vld [vmem:[%s6074_s11 + $0x20] sm:$0xff] }
 0x47b   :  { %4683 = vmatpush3.msra.mxu0 %v5674_v9  ;;  %4696 = vmatpush3.msra.mxu1 %v5709_v51  ;;  %6131 = vst [vmem:[#allocation24_spill] sm:$0xff] %v5716_v55 }
 0x47c   :  { %v2009_v60 = vsel %vm165_vm0, %v2008_v63, 0.0  ;;  %4684 = vmatprep.subr.mxu0 %v6122_v44  ;;  %4697 = vmatprep.subr.mxu1 %v6122_v44 }
 0x47d   :  { %2010 = vadd.xlane.f32.xlu0 %v2009_v60  ;;  %4685 = vmatpush3.msra.mxu0 %v5679_v35  ;;  %v5730_v60 = vld [vmem:[%s6074_s11 + $0x10] sm:$0xff] }
 0x47e   :  { %4686 = vmatprep.subr.mxu0 %v6122_v44  ;;  %4698 = vmatpush3.msra.mxu1 %v5716_v55  ;;  %6133 = vst [vmem:[#allocation26_spill] sm:$0xff] %v5730_v60  ;;  %v5742_v55 = vld [vmem:[%s6077_s14] ss:$0 sm:$0xff] }
 0x47f   :  { %4687 = vmatpush3.msra.mxu0 %v5686_v56  ;;  %4699 = vmatprep.subr.mxu1 %v6122_v44 }
 0x480   :  { %4710 = vmatprep.subr.mxu0 %v6122_v44 }
 0x506   :  { %v2011_v57 = vpop.xlane.xlu0 %2010 }
 0x507   :  { %v2013_v2 = vmul.f32 0.03125, %v2011_v57 }
 0x509   :  { %v2014_v42 = vsub.f32 %v2008_v63, %v2013_v2  ;;  %v5723_v63 = vld [vmem:[%s6074_s11 + $0x18] sm:$0xff] }
 0x50a   :  { %6132 = vst [vmem:[#allocation25_spill] sm:$0xff] %v5723_v63  ;;  %4700 = vmatpush3.msra.mxu1 %v5723_v63 }
 0x50b   :  { %v2015_v38 = vmul.f32 %v2014_v42, %v2014_v42  ;;  %4701 = vmatprep.subr.mxu1 %v6122_v44 }
 0x50c   :  { %4702 = vmatpush3.msra.mxu1 %v5730_v60 }
 0x50d   :  { %v2016_v52 = vsel %vm165_vm0, %v2015_v38, 0.0  ;;  %4703 = vmatprep.subr.mxu1 %v6122_v44 }
 0x50e   :  { %2017 = vadd.xlane.f32.xlu1 %v2016_v52 }
 0x597   :  { %v2018_v57 = vpop.xlane.xlu1 %2017 }
 0x598   :  { %v2019_v2 = vmul.f32 0.03125, %v2018_v57 }
 0x59a   :  { %v2020_v38 = vadd.f32 1e-05, %v2019_v2  ;;  %v6146_v2 = vld [vmem:[#allocation16_spill] sm:$0xff] }
 0x59c   :  { %4953 = vrsqrt.f32 %v2020_v38 }
 0x5a9   :  { %v4954_v52 = vpop.eup %4953 }
 0x5aa   :  { %v2022_v63 = vmul.f32 %v4954_v52, %v2014_v42  ;;  %v5760_v42 = vld [vmem:[%s6110_s29 + $0x8] sm:$0xff]  ;;  %v6147_v52 = vld [vmem:[#allocation17_spill] sm:$0xff] }
 0x5ac   :  { %v2029_v60 = vmul.f32 %v5737_v61, %v2022_v63  ;;  %v6145_v63 = vld [vmem:[#allocation19_spill] sm:$0xff] }
 0x5ae   :  { %v5746_v56 = vadd.f32 %v5742_v55, %v2029_v60 }
 0x5b0   :  { %4689 = vmatmul.mubr.msk.f32.vlgmr.msra.gmra.mxu0 %vm165_vm0, %v5746_v56 }
 0x5b1   :  { %4711 = vmatpush3.msra.mxu0 %v5097_v0  ;;  %4718 = vmatprep.mubr.msk.f32.mxu0 %vm5000_vm1, %v6122_v44  ;;  %v5844_v0 = vld [vmem:[%s6074_s11 + $0x8] sm:$0xff] }
 0x5b2   :  { %4712 = vmatprep.subr.mxu0 %v6122_v44  ;;  %4704 = vmatpush3.msra.mxu1 %v5844_v0 }
 0x5b3   :  { %4713 = vmatpush3.msra.mxu0 %v5109_v3  ;;  %4705 = vmatprep.subr.mxu1 %v6122_v44  ;;  %v5858_v3 = vld [vmem:[%s6073_s10] ss:$0 sm:$0xff] }
 0x5b4   :  { %4714 = vmatprep.subr.mxu0 %v6122_v44 }
 0x5b5   :  { %4715 = vmatpush3.msra.mxu0 %v5123_v5 }
 0x5b6   :  { %4716 = vmatprep.subr.mxu0 %v6122_v44 }
 0x5b7   :  { %4717 = vmatpush3.msra.mxu0 %v5137_v7 }
 0x5b8   :  { %4721 = vmatprep.subr.mxu0 %v6122_v44  ;;  %4719 = vmatmul.mubr.msk.f32.vlgmr.msra.gmra.mxu0 %vm165_vm0, %v5760_v42 }
 0x5b9   :  { %4722 = vmatpush3.msra.mxu0 %v5102_v1  ;;  %4729 = vmatprep.mubr.msk.f32.mxu0 %vm5000_vm1, %v6122_v44  ;;  %v5851_v1 = vld [vmem:[%s6074_s11] sm:$0xff] }
 0x5ba   :  { %4723 = vmatprep.subr.mxu0 %v6122_v44  ;;  %4706 = vmatpush3.msra.mxu1 %v5851_v1 }
 0x5bb   :  { %4724 = vmatpush3.msra.mxu0 %v5114_v4  ;;  %4732 = vmatprep.subr.mxu1 %v6122_v44 }
 0x5bc   :  { %4725 = vmatprep.subr.mxu0 %v6122_v44 }
 0x5bd   :  { %4726 = vmatpush3.msra.mxu0 %v5128_v6 }
 0x5be   :  { %4727 = vmatprep.subr.mxu0 %v6122_v44 }
 0x5bf   :  { %4728 = vmatpush3.msra.mxu0 %v5144_v8 }
 0x5c0   :  { %4743 = vmatprep.subr.mxu0 %v6122_v44  ;;  %4730 = vmatmul.mubr.msk.f32.vlgmr.msra.gmra.mxu0 %vm165_vm0, %v5760_v42 }
 0x5c1   :  { %4744 = vmatpush3.msra.mxu0 %v5167_v11  ;;  %4751 = vmatprep.mubr.msk.f32.mxu0 %vm5000_vm1, %v6122_v44 }
 0x5c2   :  { %4745 = vmatprep.subr.mxu0 %v6122_v44 }
 0x5c3   :  { %4746 = vmatpush3.msra.mxu0 %v5183_v13  ;;  %v6136_v13 = vld [vmem:[#allocation7_spill] sm:$0xff] }
 0x5c4   :  { %4747 = vmatprep.subr.mxu0 %v6122_v44 }
 0x5c5   :  { %4748 = vmatpush3.msra.mxu0 %v5197_v15  ;;  %v6138_v15 = vld [vmem:[#allocation9_spill] sm:$0xff] }
 0x5c6   :  { %4749 = vmatprep.subr.mxu0 %v6122_v44 }
 0x5c7   :  { %4750 = vmatpush3.msra.mxu0 %v5213_v17  ;;  %v6140_v17 = vld [vmem:[#allocation11_spill] sm:$0xff] }
 0x5c8   :  { %4765 = vmatprep.subr.mxu0 %v6122_v44  ;;  %4752 = vmatmul.mubr.msk.f32.vlgmr.msra.gmra.mxu0 %vm165_vm0, %v5760_v42 }
 0x5c9   :  { %4766 = vmatpush3.msra.mxu0 %v5231_v19  ;;  %4773 = vmatprep.mubr.msk.f32.mxu0 %vm5000_vm1, %v6122_v44 }
 0x5ca   :  { %4767 = vmatprep.subr.mxu0 %v6122_v44 }
 0x5cb   :  { %4768 = vmatpush3.msra.mxu0 %v5247_v21 }
 0x5cc   :  { %4769 = vmatprep.subr.mxu0 %v6122_v44 }
 0x5cd   :  { %4770 = vmatpush3.msra.mxu0 %v5261_v23 }
 0x5ce   :  { %4771 = vmatprep.subr.mxu0 %v6122_v44 }
 0x5cf   :  { %4772 = vmatpush3.msra.mxu0 %v5277_v25 }
 0x5d0   :  { %4787 = vmatprep.subr.mxu0 %v6122_v44  ;;  %4774 = vmatmul.mubr.msk.f32.vlgmr.msra.gmra.mxu0 %vm165_vm0, %v5760_v42 }
 0x5d1   :  { %4788 = vmatpush3.msra.mxu0 %v5295_v27  ;;  %4795 = vmatprep.mubr.msk.f32.mxu0 %vm5000_vm1, %v6122_v44 }
 0x5d2   :  { %4789 = vmatprep.subr.mxu0 %v6122_v44 }
 0x5d3   :  { %4790 = vmatpush3.msra.mxu0 %v5311_v29 }
 0x5d4   :  { %4791 = vmatprep.subr.mxu0 %v6122_v44 }
 0x5d5   :  { %4792 = vmatpush3.msra.mxu0 %v5325_v31 }
 0x5d6   :  { %4793 = vmatprep.subr.mxu0 %v6122_v44 }
 0x5d7   :  { %4794 = vmatpush3.msra.mxu0 %v5341_v33 }
 0x5d8   :  { %4796 = vmatmul.mubr.msk.f32.vlgmr.msra.gmra.mxu0 %vm165_vm0, %v5760_v42  ;;  %4809 = vmatprep.subr.mxu0 %v6122_v44 }
 0x5d9   :  { %4810 = vmatpush3.msra.mxu0 %v5403_v39  ;;  %4817 = vmatprep.mubr.msk.f32.mxu0 %vm5000_vm1, %v6122_v44  ;;  %v6142_v39 = vld [vmem:[#allocation13_spill] sm:$0xff] }
 0x5da   :  { %4811 = vmatprep.subr.mxu0 %v6122_v44 }
 0x5db   :  { %4812 = vmatpush3.msra.mxu0 %v5413_v41 }
 0x5dc   :  { %4813 = vmatprep.subr.mxu0 %v6122_v44 }
 0x5dd   :  { %4814 = vmatpush3.msra.mxu0 %v5427_v43 }
 0x5de   :  { %4815 = vmatprep.subr.mxu0 %v6122_v44 }
 0x5df   :  { %4816 = vmatpush3.msra.mxu0 %v5446_v45  ;;  %v6143_v45 = vld [vmem:[#allocation14_spill] sm:$0xff] }
 0x5e0   :  { %4818 = vmatmul.mubr.msk.f32.vlgmr.msra.gmra.mxu0 %vm165_vm0, %v5760_v42  ;;  %4831 = vmatprep.subr.mxu0 %v6122_v44 }
 0x5e1   :  { %4832 = vmatpush3.msra.mxu0 %v5456_v46  ;;  %4839 = vmatprep.mubr.msk.f32.mxu0 %vm5000_vm1, %v6122_v44 }
 0x5e2   :  { %4833 = vmatprep.subr.mxu0 %v6122_v44 }
 0x5e3   :  { %4834 = vmatpush3.msra.mxu0 %v5462_v47 }
 0x5e4   :  { %4835 = vmatprep.subr.mxu0 %v6122_v44 }
 0x5e5   :  { %4836 = vmatpush3.msra.mxu0 %v5473_v48  ;;  %v6144_v48 = vld [vmem:[#allocation15_spill] sm:$0xff] }
 0x5e6   :  { %4837 = vmatprep.subr.mxu0 %v6122_v44 }
 0x5e7   :  { %4838 = vmatpush3.msra.mxu0 %v5481_v49 }
 0x5e8   :  { %4840 = vmatmul.mubr.msk.f32.vlgmr.msra.gmra.mxu0 %vm165_vm0, %v5760_v42  ;;  %4852 = vmatprep.subr.mxu0 %v6122_v44 }
 0x5e9   :  { %4854 = vmatprep.mubr.msk.f32.mxu0 %vm5000_vm1, %v6122_v44 }
 0x670   :  { %v2112_v4 = vpop.f32.mrf.mxu0 }
 0x671   :  { %v2113_v5 = vadd.f32 %v5858_v3, %v2112_v4 }
 0x672   :  { %v4690_v6 = vpop.f32.mrf.mxu0 }
 0x673   :  { %v2116_v7 = vmax.f32 %v2113_v5, 0.0  ;;  %v6148_v6 = vld [vmem:[#allocation18_spill] sm:$0xff] }
 0x675   :  { %4708 = vmatmul.mubr.msk.f32.vlgmr.msra.gmra.mxu1 %vm2123_vm3, %v2116_v7 }
 0x676   :  { %4733 = vmatpush3.msra.mxu1 %v5162_v10  ;;  %4740 = vmatprep.mubr.msk.f32.mxu1 %vm5000_vm1, %v6122_v44  ;;  %v6134_v10 = vld [vmem:[#allocation5_spill] sm:$0xff] }
 0x677   :  { %4734 = vmatprep.subr.mxu1 %v6122_v44 }
 0x678   :  { %4735 = vmatpush3.msra.mxu1 %v5178_v12  ;;  %v5867_v8 = vpop.f32.mrf.mxu0  ;;  %v6135_v12 = vld [vmem:[#allocation6_spill] sm:$0xff] }
 0x679   :  { %4736 = vmatprep.subr.mxu1 %v6122_v44 }
 0x67a   :  { %4737 = vmatpush3.msra.mxu1 %v5192_v14  ;;  %v4720_v11 = vpop.f32.mrf.mxu0  ;;  %v6137_v14 = vld [vmem:[#allocation8_spill] sm:$0xff] }
 0x67b   :  { %4738 = vmatprep.subr.mxu1 %v6122_v44  ;;  %v6149_v11 = vld [vmem:[#allocation21_spill] sm:$0xff] }
 0x67c   :  { %4739 = vmatpush3.msra.mxu1 %v5206_v16  ;;  %v6139_v16 = vld [vmem:[#allocation10_spill] sm:$0xff] }
 0x67d   :  { %4741 = vmatmul.mubr.msk.f32.vlgmr.msra.gmra.mxu1 %vm165_vm0, %v5760_v42  ;;  %4754 = vmatprep.subr.mxu1 %v6122_v44 }
 0x67e   :  { %4755 = vmatpush3.msra.mxu1 %v5226_v18  ;;  %4762 = vmatprep.mubr.msk.f32.mxu1 %vm5000_vm1, %v6122_v44 }
 0x67f   :  { %4756 = vmatprep.subr.mxu1 %v6122_v44 }
 0x680   :  { %4757 = vmatpush3.msra.mxu1 %v5242_v20  ;;  %v2367_v18 = vpop.f32.mrf.mxu0 }
 0x681   :  { %4758 = vmatprep.subr.mxu1 %v6122_v44  ;;  %v2368_v49 = vadd.f32 %v6144_v48, %v2367_v18 }
 0x682   :  { %4759 = vmatpush3.msra.mxu1 %v5256_v22  ;;  %v4731_v19 = vpop.f32.mrf.mxu0 }
 0x683   :  { %4760 = vmatprep.subr.mxu1 %v6122_v44  ;;  %v3072_v57 = vmul.f32 0.35355338, %v2368_v49 }
 0x684   :  { %4761 = vmatpush3.msra.mxu1 %v5270_v24 }
 0x685   :  { %4763 = vmatmul.mubr.msk.f32.vlgmr.msra.gmra.mxu1 %vm165_vm0, %v5760_v42  ;;  %4776 = vmatprep.subr.mxu1 %v6122_v44 }
 0x686   :  { %4777 = vmatpush3.msra.mxu1 %v5290_v26  ;;  %4784 = vmatprep.mubr.msk.f32.mxu1 %vm5000_vm1, %v6122_v44 }
 0x687   :  { %4778 = vmatprep.subr.mxu1 %v6122_v44 }
 0x688   :  { %4779 = vmatpush3.msra.mxu1 %v5306_v28  ;;  %v2507_v20 = vpop.f32.mrf.mxu0 }
 0x689   :  { %4780 = vmatprep.subr.mxu1 %v6122_v44  ;;  %v2508_v4 = vadd.f32 %v6147_v52, %v2507_v20 }
 0x68a   :  { %4781 = vmatpush3.msra.mxu1 %v5320_v30  ;;  %v4753_v21 = vpop.f32.mrf.mxu0 }
 0x68b   :  { %4782 = vmatprep.subr.mxu1 %v6122_v44 }
 0x68c   :  { %4783 = vmatpush3.msra.mxu1 %v5334_v32  ;;  %v6141_v32 = vld [vmem:[#allocation12_spill] sm:$0xff] }
 0x68d   :  { %4785 = vmatmul.mubr.msk.f32.vlgmr.msra.gmra.mxu1 %vm165_vm0, %v5760_v42  ;;  %4798 = vmatprep.subr.mxu1 %v6122_v44  ;;  %v2298_v33 = vadd.f32 %v6141_v32, %v5867_v8 }
 0x68e   :  { %4799 = vmatpush3.msra.mxu1 %v5364_v34  ;;  %4806 = vmatprep.mubr.msk.f32.mxu1 %vm5000_vm1, %v6122_v44 }
 0x68f   :  { %4800 = vmatprep.subr.mxu1 %v6122_v44  ;;  %v3071_v47 = vmul.f32 0.35355338, %v2298_v33 }
 0x690   :  { %4801 = vmatpush3.msra.mxu1 %v6134_v10  ;;  %v2647_v22 = vpop.f32.mrf.mxu0 }
 0x691   :  { %4802 = vmatprep.subr.mxu1 %v6122_v44  ;;  %v2648_v46 = vadd.f32 %v6143_v45, %v2647_v22 }
 0x692   :  { %4803 = vmatpush3.msra.mxu1 %v6135_v12  ;;  %v4775_v23 = vpop.f32.mrf.mxu0 }
 0x693   :  { %4804 = vmatprep.subr.mxu1 %v6122_v44 }
 0x694   :  { %4805 = vmatpush3.msra.mxu1 %v6136_v13  ;;  %v3074_v13 = vmul.f32 0.35355338, %v2508_v4 }
 0x695   :  { %4820 = vmatprep.subr.mxu1 %v6122_v44  ;;  %4807 = vmatmul.mubr.msk.f32.vlgmr.msra.gmra.mxu1 %vm165_vm0, %v5760_v42 }
 0x696   :  { %4821 = vmatpush3.msra.mxu1 %v6137_v14  ;;  %4828 = vmatprep.mubr.msk.f32.mxu1 %vm5000_vm1, %v6122_v44 }
 0x697   :  { %4822 = vmatprep.subr.mxu1 %v6122_v44 }
 0x698   :  { %4823 = vmatpush3.msra.mxu1 %v6138_v15  ;;  %v2787_v24 = vpop.f32.mrf.mxu0  ;;  %v6150_v15 = vld [vmem:[#allocation20_spill] sm:$0xff] }
 0x699   :  { %4824 = vmatprep.subr.mxu1 %v6122_v44  ;;  %v2788_v60 = vadd.f32 %v6145_v63, %v2787_v24 }
 0x69a   :  { %4825 = vmatpush3.msra.mxu1 %v6139_v16  ;;  %v4797_v25 = vpop.f32.mrf.mxu0 }
 0x69b   :  { %4826 = vmatprep.subr.mxu1 %v6122_v44 }
 0x69c   :  { %4827 = vmatpush3.msra.mxu1 %v6140_v17 }
 0x69d   :  { %4829 = vmatmul.mubr.msk.f32.vlgmr.msra.gmra.mxu1 %vm165_vm0, %v5760_v42  ;;  %4842 = vmatprep.subr.mxu1 %v6122_v44 }
 0x69e   :  { %4844 = vmatprep.mubr.msk.f32.mxu1 %vm5000_vm1, %v6122_v44 }
 0x6a0   :  { %v2927_v26 = vpop.f32.mrf.mxu0 }
 0x6a1   :  { %v2928_v10 = vadd.f32 %v6149_v11, %v2927_v26 }
 0x6a2   :  { %v4819_v27 = vpop.f32.mrf.mxu0 }
 0x6a8   :  { %v5961_v20 = vpop.f32.mrf.mxu0 }
 0x6aa   :  { %v4841_v21 = vpop.f32.mrf.mxu0 }
 0x735   :  { %v5926_v28 = vpop.f32.mrf.mxu1 }
 0x737   :  { %v4709_v29 = vpop.f32.mrf.mxu1 }
 0x73d   :  { %v2437_v30 = vpop.f32.mrf.mxu1 }
 0x73e   :  { %v2438_v38 = vadd.f32 %v6146_v2, %v2437_v30 }
 0x73f   :  { %v4742_v31 = vpop.f32.mrf.mxu1 }
 0x740   :  { %v3073_v12 = vmul.f32 0.35355338, %v2438_v38 }
 0x745   :  { %v2577_v34 = vpop.f32.mrf.mxu1 }
 0x746   :  { %v2578_v41 = vadd.f32 %v6142_v39, %v2577_v34 }
 0x747   :  { %v4764_v43 = vpop.f32.mrf.mxu1 }
 0x748   :  { %4843 = vmatpush3.xpose.msk.msra.mxu1 %vm1061_vm2, %v2578_v41 }
 0x749   :  { %4847 = vmatprep.subr.mxu1 %v6122_v44 }
 0x74b   :  { %4845 = vmatmul.mubr.msk.f32.vlgmr.msra.gmra.mxu1 %vm1061_vm2, %v3071_v47 }
 0x74c   :  { %4848 = vmatpush3.xpose.msk.msra.mxu1 %vm1061_vm2, %v2648_v46  ;;  %4849 = vmatprep.mubr.msk.f32.mxu1 %vm5000_vm1, %v6122_v44 }
 0x74d   :  { %v2717_v5 = vpop.f32.mrf.mxu1  ;;  %4857 = vmatprep.subr.mxu1 %v6122_v44 }
 0x74e   :  { %v2718_v7 = vadd.f32 %v6148_v6, %v2717_v5 }
 0x74f   :  { %v4786_v8 = vpop.f32.mrf.mxu1  ;;  %4850 = vmatmul.mubr.msk.f32.vlgmr.msra.gmra.mxu1 %vm1061_vm2, %v3072_v57 }
 0x750   :  { %4853 = vmatpush3.xpose.msk.msra.mxu0 %vm1061_vm2, %v2718_v7  ;;  %4858 = vmatpush3.xpose.msk.msra.mxu1 %vm1061_vm2, %v2788_v60 }
 0x751   :  { %4859 = vmatprep.mubr.msk.f32.mxu1 %vm5000_vm1, %v6122_v44  ;;  %4862 = vmatprep.subr.mxu0 %v6122_v44 }
 0x752   :  { %4867 = vmatprep.subr.mxu1 %v6122_v44 }
 0x753   :  { %4855 = vmatmul.mubr.msk.f32.vlgmr.msra.gmra.mxu0 %vm1061_vm2, %v3073_v12  ;;  %4860 = vmatmul.mubr.msk.f32.vlgmr.msra.gmra.mxu1 %vm1061_vm2, %v3074_v13 }
 0x754   :  { %4868 = vmatpush3.msra.mxu1 %v2928_v10  ;;  %4864 = vmatprep.mubr.msk.f32.mxu0 %vm5000_vm1, %v6122_v44 }
 0x755   :  { %v2857_v14 = vpop.f32.mrf.mxu1  ;;  %4869 = vmatprep.mubr.msk.f32.mxu1 %vm5000_vm1, %v6122_v44  ;;  %4877 = vmatprep.subr.mxu1 %v6122_v44 }
 0x756   :  { %v2858_v16 = vadd.f32 %v6150_v15, %v2857_v14 }
 0x757   :  { %v4808_v17 = vpop.f32.mrf.mxu1 }
 0x758   :  { %4863 = vmatpush3.msra.mxu0 %v2858_v16 }
 0x759   :  { %4872 = vmatprep.subr.mxu0 %v6122_v44 }
 0x75d   :  { %v2997_v18 = vpop.f32.mrf.mxu1 }
 0x75e   :  { %v2998_v17 = vadd.f32 %v5586_v53, %v2997_v18 }
 0x75f   :  { %v4830_v19 = vpop.f32.mrf.mxu1 }
 0x80b   :  { %v3147_v22 = vpop.f32.mrf.mxu1 }
 0x80c   :  { %v3379_v23 = vsel %vm1061_vm2, %v3147_v22, -inf }
 0x80d   :  { %3380 = vmax.xlane.f32.xlu0 %v3379_v23  ;;  %v4846_v24 = vpop.f32.mrf.mxu1 }
 0x80f   :  { %v3223_v25 = vpop.f32.mrf.mxu1 }
 0x810   :  { %v3382_v26 = vsel %vm1061_vm2, %v3223_v25, -inf }
 0x811   :  { %3383 = vmax.xlane.f32.xlu1 %v3382_v26  ;;  %v4851_v27 = vpop.f32.mrf.mxu1 }
 0x813   :  { %v3299_v29 = vpop.f32.mrf.mxu0  ;;  %v3375_v30 = vpop.f32.mrf.mxu1 }
 0x814   :  { %v3388_v31 = vsel %vm1061_vm2, %v3375_v30, -inf  ;;  %v3385_v32 = vsel %vm1061_vm2, %v3299_v29, -inf }
 0x815   :  { %3389 = vmax.xlane.f32.xlu1 %v3388_v31  ;;  %v4861_v33 = vpop.f32.mrf.mxu1  ;;  %3386 = vmax.xlane.f32.xlu0 %v3385_v32  ;;  %v4856_v34 = vpop.f32.mrf.mxu0 }
 0x896   :  { %v3381_v39 = vpop.xlane.xlu0 %3380 }
 0x897   :  { %v3391_v41 = vsub.f32 %v3147_v22, %v3381_v39  ;;  %v3068_v22 = vadd.f32 %v5593_v58, %v5961_v20 }
 0x899   :  { %v3395_v43 = vmul.f32 1.442695, %v3391_v41 }
 0x89a   :  { %v3384_v45 = vpop.xlane.xlu1 %3383 }
 0x89b   :  { %4955 = vpow2.f32 %v3395_v43  ;;  %v3392_v46 = vsub.f32 %v3223_v25, %v3384_v45 }
 0x89d   :  { %v3397_v47 = vmul.f32 1.442695, %v3392_v46 }
 0x89e   :  { %v3390_v48 = vpop.xlane.xlu1 %3389  ;;  %v3387_v49 = vpop.xlane.xlu0 %3386 }
 0x89f   :  { %4957 = vpow2.f32 %v3397_v47  ;;  %v3394_v63 = vsub.f32 %v3375_v30, %v3390_v48  ;;  %v3393_v60 = vsub.f32 %v3299_v29, %v3387_v49  ;;  %v6155_v47 = vld [vmem:[#allocation22_spill] sm:$0xff] }
 0x8a1   :  { %v3401_v57 = vmul.f32 1.442695, %v3394_v63  ;;  %v3399_v2 = vmul.f32 1.442695, %v3393_v60 }
 0x8a3   :  { %4959 = vpow2.f32 %v3401_v57 }
 0x8a4   :  { %4961 = vpow2.f32 %v3399_v2 }
 0x8a8   :  { %v4956_v38 = vpop.eup %4955 }
 0x8a9   :  { %v3403_v52 = vsel %vm1061_vm2, %v4956_v38, 0.0 }
 0x8aa   :  { %3404 = vadd.xlane.f32.xlu0 %v3403_v52 }
 0x8ac   :  { %v4958_v4 = vpop.eup %4957 }
 0x8ad   :  { %v3406_v5 = vsel %vm1061_vm2, %v4958_v4, 0.0 }
 0x8ae   :  { %3407 = vadd.xlane.f32.xlu1 %v3406_v5 }
 0x8b0   :  { %v4960_v6 = vpop.eup %4959 }
 0x8b1   :  { %v4962_v7 = vpop.eup %4961  ;;  %v3412_v8 = vsel %vm1061_vm2, %v4960_v6, 0.0 }
 0x8b2   :  { %3413 = vadd.xlane.f32.xlu1 %v3412_v8  ;;  %v3409_v11 = vsel %vm1061_vm2, %v4962_v7, 0.0 }
 0x8b3   :  { %3410 = vadd.xlane.f32.xlu0 %v3409_v11 }
 0x933   :  { %v3405_v10 = vpop.xlane.xlu0 %3404 }
 0x934   :  { %4963 = vrcp.f32 %v3405_v10 }
 0x937   :  { %v3408_v12 = vpop.xlane.xlu1 %3407 }
 0x938   :  { %4965 = vrcp.f32 %v3408_v12 }
 0x93b   :  { %v3414_v13 = vpop.xlane.xlu1 %3413 }
 0x93c   :  { %4967 = vrcp.f32 %v3414_v13  ;;  %v3411_v14 = vpop.xlane.xlu0 %3410 }
 0x93d   :  { %4969 = vrcp.f32 %v3411_v14 }
 0x941   :  { %v4964_v15 = vpop.eup %4963 }
 0x942   :  { %v3419_v16 = vmul.f32 %v4964_v15, %v4956_v38 }
 0x944   :  { %4865 = vmatmul.mubr.msk.f32.vlgmr.msra.gmra.mxu0 %vm1061_vm2, %v3419_v16 }
 0x945   :  { %v4966_v19 = vpop.eup %4965  ;;  %4873 = vmatpush3.msra.mxu0 %v2998_v17  ;;  %4874 = vmatprep.mubr.msk.f32.mxu0 %vm5000_vm1, %v6122_v44 }
 0x946   :  { %v3420_v21 = vmul.f32 %v4966_v19, %v4958_v4  ;;  %4882 = vmatprep.subr.mxu0 %v6122_v44 }
 0x948   :  { %4870 = vmatmul.mubr.msk.f32.vlgmr.msra.gmra.mxu1 %vm1061_vm2, %v3420_v21  ;;  %v4259_v21 = vld [vmem:[%s6078_s15] ss:$0 sm:$0xff]  ;;  %s5001_s15 = smov [#allocation2]  }
 0x949   :  { %v4968_v23 = vpop.eup %4967  ;;  %4878 = vmatpush3.msra.mxu1 %v3068_v22  ;;  %4879 = vmatprep.mubr.msk.f32.mxu1 %vm5000_vm1, %v6122_v44 }
 0x94a   :  { %v4970_v53 = vpop.eup %4969  ;;  %v3422_v18 = vmul.f32 %v4968_v23, %v4960_v6  ;;  %4887 = vmatprep.subr.mxu1 %v6122_v44 }
 0x94b   :  { %v3421_v24 = vmul.f32 %v4970_v53, %v4962_v7  ;;  %v4260_v53 = vld [vmem:[%s6079_s16] ss:$0 sm:$0xff]  ;;  %s4201_s16 = sshll.u32 %s5001_s15, 4  ;;  %s4202_s16 = int_to_ptr.vmem [resolvable:$true] %s4201_s16 }
 0x94c   :  { %4880 = vmatmul.mubr.msk.f32.vlgmr.msra.gmra.mxu1 %vm1061_vm2, %v3422_v18  ;;  %s4977_s27 = scalar_lea.vmem %s4202_s16, 256  ;;  %p4982_p1 = scmp.lt.s32.totalorder %s4202_s16, %s4202_s16 }
 0x94d   :  { %4875 = vmatmul.mubr.msk.f32.vlgmr.msra.gmra.mxu0 %vm1061_vm2, %v3421_v24  ;;  %4888 = vmatpush3.msra.mxu1 %v5621_v40  ;;  %p4978_p0 = scmp.ne.s32.totalorder %s4202_s16, %s4977_s27  ;;  %p4983_p2 = scmp.lt.s32.totalorder %s4977_s27, %s4977_s27 }
 0x94e   :  { %4883 = vmatpush3.msra.mxu0 %v5614_v50  ;;  %4884 = vmatprep.mubr.msk.f32.mxu0 %vm5000_vm1, %v6122_v44 }
 0x94f   :  { %4889 = vmatprep.mubr.msk.f32.mxu1 %vm5000_vm1, %v6122_v44  ;;  %4892 = vmatprep.subr.mxu0 %v6122_v44  ;;  %p4984_p3 = por %p4983_p2, %p4982_p1 }
 0x950   :  { %4897 = vmatprep.subr.mxu1 %v6122_v44 }
 0x951   :  { %p4985_p4 = pnand %p4984_p3, %p4978_p0 }
 0xa04   :  { %v3492_v58 = vpop.f32.mrf.mxu0 }
 0xa05   :  { %4885 = vmatmul.mubr.msk.f32.vlgmr.msra.gmra.mxu0 %vm1061_vm2, %v3492_v58 }
 0xa06   :  { %v4866_v20 = vpop.f32.mrf.mxu0  ;;  %4893 = vmatpush3.msra.mxu0 %v5628_v54  ;;  %4894 = vmatprep.mubr.msk.f32.mxu0 %vm5000_vm1, %v6122_v44 }
 0xa07   :  { %4902 = vmatprep.subr.mxu0 %v6122_v44 }
 0xa08   :  { %v3565_v50 = vpop.f32.mrf.mxu1 }
 0xa09   :  { %4890 = vmatmul.mubr.msk.f32.vlgmr.msra.gmra.mxu1 %vm1061_vm2, %v3565_v50 }
 0xa0a   :  { %v4871_v40 = vpop.f32.mrf.mxu1  ;;  %4898 = vmatpush3.msra.mxu1 %v5637_v37  ;;  %4899 = vmatprep.mubr.msk.f32.mxu1 %vm5000_vm1, %v6122_v44  ;;  %v6151_v37 = vld [vmem:[#allocation23_spill] sm:$0xff] }
 0xa0b   :  { %4913 = vmatprep.subr.mxu1 %v6122_v44 }
 0xa0c   :  { %v3711_v25 = vpop.f32.mrf.mxu1 }
 0xa0d   :  { %v3638_v26 = vpop.f32.mrf.mxu0  ;;  %4900 = vmatmul.mubr.msk.f32.vlgmr.msra.gmra.mxu1 %vm1061_vm2, %v3711_v25 }
 0xa0e   :  { %4895 = vmatmul.mubr.msk.f32.vlgmr.msra.gmra.mxu0 %vm1061_vm2, %v3638_v26  ;;  %v4881_v54 = vpop.f32.mrf.mxu1  ;;  %4914 = vmatpush3.msra.mxu1 %v5695_v59 }
 0xa0f   :  { %v4876_v27 = vpop.f32.mrf.mxu0  ;;  %4903 = vmatpush3.msra.mxu0 %v5667_v36  ;;  %4910 = vmatprep.mubr.msk.f32.mxu0 %vm5000_vm1, %v6122_v44  ;;  %v6152_v36 = vld [vmem:[#allocation24_spill] sm:$0xff] }
 0xa10   :  { %4904 = vmatprep.subr.mxu0 %v6122_v44  ;;  %4915 = vmatprep.subr.mxu1 %v6122_v44 }
 0xa11   :  { %4905 = vmatpush3.msra.mxu0 %v5674_v9  ;;  %4916 = vmatpush3.msra.mxu1 %v5702_v62  ;;  %v6153_v9 = vld [vmem:[#allocation25_spill] sm:$0xff] }
 0xa12   :  { %4906 = vmatprep.subr.mxu0 %v6122_v44  ;;  %4917 = vmatprep.subr.mxu1 %v6122_v44 }
 0xa13   :  { %4907 = vmatpush3.msra.mxu0 %v5679_v35  ;;  %4918 = vmatpush3.msra.mxu1 %v5709_v51  ;;  %v6154_v35 = vld [vmem:[#allocation26_spill] sm:$0xff] }
 0xa14   :  { %4908 = vmatprep.subr.mxu0 %v6122_v44  ;;  %4919 = vmatprep.subr.mxu1 %v6122_v44 }
 0xa15   :  { %4909 = vmatpush3.msra.mxu0 %v6151_v37  ;;  %4920 = vmatpush3.msra.mxu1 %v6152_v36 }
 0xa16   :  { %4921 = vmatprep.subr.mxu1 %v6122_v44  ;;  %4929 = vmatprep.mubr.msk.f32.mxu1 %vm5000_vm1, %v6122_v44 }
 0xa17   :  { %4922 = vmatpush3.msra.mxu1 %v6153_v9 }
 0xa18   :  { %4923 = vmatprep.subr.mxu1 %v6122_v44 }
 0xa19   :  { %4924 = vmatpush3.msra.mxu1 %v6154_v35 }
 0xa1a   :  { %4925 = vmatprep.subr.mxu1 %v6122_v44 }
 0xa1b   :  { %4926 = vmatpush3.msra.mxu1 %v5844_v0 }
 0xa1c   :  { %4927 = vmatprep.subr.mxu1 %v6122_v44  ;;  %v4257_v44 = vld [vmem:[%s6075_s12] ss:$0 sm:$0xff] }
 0xa1d   :  { %4928 = vmatpush3.msra.mxu1 %v5851_v1  ;;  %v2194_v46 = vadd.f32 %v4257_v44, %v5926_v28 }
 0xa1f   :  { %v2197_v60 = vadd.f32 %v2194_v46, %v5746_v56 }
 0xa21   :  { %v2198_v57 = vsel %vm165_vm0, %v2197_v60, 0.0 }
 0xac5   :  { %v3784_v59 = vpop.f32.mrf.mxu0 }
 0xac6   :  { %v4007_v31 = vsel %vm165_vm0, %v3784_v59, 0.0 }
 0xac7   :  { %v4886_v62 = vpop.f32.mrf.mxu0 }
 0xac9   :  { %v3857_v51 = vpop.f32.mrf.mxu1 }
 0xaca   :  { %v4008_v29 = vsel %vm165_vm0, %v3857_v51, 0.0 }
 0xacb   :  { %v4891_v30 = vpop.f32.mrf.mxu1  ;;  %v4009_v33 = vadd.f32 %v4008_v29, %v4007_v31 }
 0xacd   :  { %v4003_v32 = vpop.f32.mrf.mxu1 }
 0xace   :  { %v3930_v34 = vpop.f32.mrf.mxu0  ;;  %v4012_v1 = vsel %vm165_vm0, %v4003_v32, 0.0 }
 0xacf   :  { %v4010_v39 = vsel %vm165_vm0, %v3930_v34, 0.0  ;;  %v4901_v41 = vpop.f32.mrf.mxu1 }
 0xad0   :  { %v4011_v43 = vadd.f32 %v4010_v39, %v4009_v33  ;;  %v4896_v0 = vpop.f32.mrf.mxu0 }
 0xad2   :  { %v4013_v45 = vadd.f32 %v4012_v1, %v4011_v43 }
 0xad4   :  { %v4014_v48 = vadd.f32 %v6155_v47, %v4013_v45 }
 0xad6   :  { %v4015_v49 = vadd.f32 %v5760_v42, %v4014_v48 }
 0xad8   :  { %v4016_v63 = vsel %vm165_vm0, %v4015_v49, 0.0 }
 0xad9   :  { %4017 = vadd.xlane.f32.xlu0 %v4016_v63 }
 0xadd   :  { %2199 = vadd.xlane.f32.xlu0 %v2198_v57 }
 0xb62   :  { %v4018_v2 = vpop.xlane.xlu0 %4017 }
 0xb63   :  { %v4019_v38 = vmul.f32 0.03125, %v4018_v2 }
 0xb65   :  { %v4020_v52 = vsub.f32 %v4015_v49, %v4019_v38 }
 0xb66   :  { %v2200_v4 = vpop.xlane.xlu0 %2199 }
 0xb67   :  { %v2201_v5 = vmul.f32 0.03125, %v2200_v4  ;;  %v4021_v6 = vmul.f32 %v4020_v52, %v4020_v52 }
 0xb69   :  { %v2202_v7 = vsub.f32 %v2197_v60, %v2201_v5  ;;  %v4022_v28 = vsel %vm165_vm0, %v4021_v6, 0.0 }
 0xb6a   :  { %4023 = vadd.xlane.f32.xlu1 %v4022_v28 }
 0xb6b   :  { %v2203_v8 = vmul.f32 %v2202_v7, %v2202_v7 }
 0xb6d   :  { %v2204_v42 = vsel %vm165_vm0, %v2203_v8, 0.0 }
 0xb6e   :  { %2205 = vadd.xlane.f32.xlu0 %v2204_v42 }
 0xbf3   :  { %v4024_v11 = vpop.xlane.xlu1 %4023 }
 0xbf4   :  { %v4025_v56 = vmul.f32 0.03125, %v4024_v11 }
 0xbf6   :  { %v4026_v10 = vadd.f32 1e-05, %v4025_v56 }
 0xbf7   :  { %v2206_v12 = vpop.xlane.xlu0 %2205 }
 0xbf8   :  { %4971 = vrsqrt.f32 %v4026_v10  ;;  %v2207_v13 = vmul.f32 0.03125, %v2206_v12 }
 0xbfa   :  { %v2208_v14 = vadd.f32 1e-05, %v2207_v13 }
 0xbfc   :  { %4973 = vrsqrt.f32 %v2208_v14 }
 0xc05   :  { %v4972_v15 = vpop.eup %4971 }
 0xc06   :  { %v4028_v16 = vmul.f32 %v4972_v15, %v4020_v52 }
 0xc08   :  { %v4029_v17 = vmul.f32 %v5737_v61, %v4028_v16 }
 0xc09   :  { %v4974_v19 = vpop.eup %4973 }
 0xc0a   :  { %v4030_v22 = vadd.f32 %v5742_v55, %v4029_v17  ;;  %v2210_v23 = vmul.f32 %v4974_v19, %v2202_v7 }
 0xc0c   :  { %4911 = vmatmul.mubr.msk.f32.vlgmr.msra.gmra.mxu0 %vm165_vm0, %v4030_v22  ;;  %v2217_v18 = vmul.f32 %v4259_v21, %v2210_v23 }
 0xc0e   :  { %v2224_v24 = vadd.f32 %v4260_v53, %v2217_v18 }
 0xc10   :  { %2225 = vst.msk [vmem:[#allocation2] sm:$0xff] %vm165_vm0, %v2224_v24 }
 0xccc   :  { %v4100_v58 = vpop.f32.mrf.mxu0 }
 0xccd   :  { %v4101_v61 = vadd.f32 %v5858_v3, %v4100_v58 }
 0xcce   :  { %v4912_v20 = vpop.f32.mrf.mxu0 }
 0xccf   :  { %v4104_v50 = vmax.f32 %v4101_v61, 0.0 }
 0xcd1   :  { %4930 = vmatmul.mubr.msk.f32.vlgmr.msra.gmra.mxu1 %vm2123_vm3, %v4104_v50 }
 0xd91   :  { %v4174_v40 = vpop.f32.mrf.mxu1 }
 0xd92   :  { %v4175_v55 = vadd.f32 %v4257_v44, %v4174_v40 }
 0xd93   :  { %v4931_v25 = vpop.f32.mrf.mxu1 }
 0xd94   :  { %v4178_v26 = vadd.f32 %v4175_v55, %v4030_v22 }
 0xd96   :  { %v4179_v54 = vsel %vm165_vm0, %v4178_v26, 0.0 }
 0xd97   :  { %4180 = vadd.xlane.f32.xlu1 %v4179_v54 }
 0xe20   :  { %v4181_v27 = vpop.xlane.xlu1 %4180 }
 0xe21   :  { %v4182_v37 = vmul.f32 0.03125, %v4181_v27 }
 0xe23   :  { %v4183_v36 = vsub.f32 %v4178_v26, %v4182_v37 }
 0xe25   :  { %v4184_v9 = vmul.f32 %v4183_v36, %v4183_v36 }
 0xe27   :  { %v4185_v35 = vsel %vm165_vm0, %v4184_v9, 0.0 }
 0xe28   :  { %4186 = vadd.xlane.f32.xlu1 %v4185_v35 }
 0xeb1   :  { %v4187_v59 = vpop.xlane.xlu1 %4186 }
 0xeb2   :  { %v4188_v3 = vmul.f32 0.03125, %v4187_v59 }
 0xeb4   :  { %v4189_v62 = vadd.f32 1e-05, %v4188_v3 }
 0xeb6   :  { %4975 = vrsqrt.f32 %v4189_v62 }
 0xec3   :  { %v4976_v51 = vpop.eup %4975 }
 0xec4   :  { %v4191_v29 = vmul.f32 %v4976_v51, %v4183_v36 }
 0xec6   :  { %v4192_v30 = vmul.f32 %v4259_v21, %v4191_v29 }
 0xec8   :  { %v4193_v31 = vadd.f32 %v4260_v53, %v4192_v30 }
 0xeca   :  { %4195 = vst.msk [vmem:[#allocation2 + $0x8] sm:$0xff] %vm165_vm0, %v4193_v31 }
 0xecb   :  { %4988 = shalt.err (!%p4985_p4)
}
 0xecc   :  { %s5002_s9 = smov 128   ;;  %s5003_s6 = smov 8  }
 0xecd   :  { %4207 = dma.vmem_to_hbm [thread:$0]  %s4202_s16, 256, %s6080_s17, [#allocation3], %s5002_s9, %s5002_s9, %s5003_s6  }
 0xece   :  { %4997 = dma.done.wait [#allocation3], 256  }
 0xecf   :  { %4998 = vsyncadd [#allocation3], 4294967040 }
 0xed0   :  { %4211 = vsyncpa [#allocation3], 1 }

</bundles_post_ra>
